<compile_context>
chip_gen: v6e
topology: v6e:2x2x1
jax: 0.10.0
libtpu: 0.0.40
codegen_flags: <defaults>
</compile_context>

<pallas_src>
import math

import jax
import jax.numpy as jnp
from jax import lax
from jax.experimental import pallas as pl
from jax.experimental.pallas import tpu as pltpu

EPS = 1e-4  # GlowTTS modules.LayerNorm eps (channel-wise LayerNorm)


def _round_up(x, m):
    return (x + m - 1) // m * m


def _layer_norm(x, gamma, beta):
    # x: (T, C) f32; gamma/beta: (1, C). Channel-wise LayerNorm (GlowTTS style).
    mean = jnp.mean(x, axis=-1, keepdims=True)
    var = jnp.mean((x - mean) ** 2, axis=-1, keepdims=True)
    return (x - mean) * lax.rsqrt(var + EPS) * gamma + beta


def make_text_encoder_kernel(cfg, T, OUT_W):
    V = cfg["n_vocab"]
    H = cfg["hidden_channels"]
    nH = cfg["n_heads"]
    L = cfg["n_layers"]
    K = cfg["kernel_size"]
    O = cfg["out_channels"]
    hd = H // nH
    pad = K // 2
    scale = 1.0 / math.sqrt(hd)
    bf16 = jnp.bfloat16

    def kernel(len_ref, tok_ref, emb_ref,
               qkv_w_ref, qkv_b_ref, o_w_ref, o_b_ref, ln_g_ref, ln_b_ref,
               f1w_ref, f1b_ref, f2w_ref, f2b_ref,
               pms_w_ref, pms_b_ref,
               dp1w_ref, dp1p_ref, dp2w_ref, dp2p_ref, dppw_ref, dppb_ref,
               out_ref):
        b = pl.program_id(0)
        seq_len = len_ref[b]

        # ---- per-batch masks (vectorised; no Python loop over (BT,BT)) -------
        rows = lax.broadcasted_iota(jnp.int32, (T, 1), 0)
        cols = lax.broadcasted_iota(jnp.int32, (1, T), 1)
        valid = rows < seq_len                        # (T, 1) bool
        mask = valid.astype(jnp.float32)              # (T, 1)
        # additive attention bias, computed once, reused by all heads & layers.
        attn_bias = jnp.where(valid & (cols < seq_len),
                              jnp.float32(0.0), jnp.float32(-1e4))   # (T, T)

        # static per-tap edge masks reproducing nn.Conv1d 'same' zero padding.
        edge = {}
        for j in range(K):
            d = j - pad
            if d == 0:
                continue
            edge[d] = ((rows >= max(0, -d)) &
                       (rows < T - max(0, d))).astype(jnp.float32)

        def conv1d_same(x, w_flat):
            # x: (T, Cin) f32; w_flat: (K*Cin, Cout) bf16.
            # All K taps fused into one MXU contraction over K*Cin.
            taps = []
            for j in range(K):
                d = j - pad
                if d == 0:
                    taps.append(x)
                else:
                    # XLU sublane rotate + static edge mask == zero 'same' pad.
                    taps.append(pltpu.roll(x, (-d) % T, axis=0) * edge[d])
            xcat = taps[0] if K == 1 else jnp.concatenate(taps, axis=-1)
            return jnp.dot(xcat.astype(bf16), w_flat,
                           preferred_element_type=jnp.float32)

        # ---- embedding gather fused as a one-hot matmul (fine for small V) ---
        onehot = (tok_ref[...] ==
                  lax.broadcasted_iota(jnp.int32, (T, V), 1))
        x = jnp.dot(onehot.astype(jnp.float32).astype(bf16), emb_ref[...],
                    preferred_element_type=jnp.float32) * math.sqrt(H)

        # ---- encoder: L x (masked MHA + LN, masked conv-FFN + LN) ------------
        for l in range(L):
            xm = x * mask
            # fused QKV projection: one (T,H) @ (H,3H) matmul
            qkv = jnp.dot(xm.astype(bf16), qkv_w_ref[l],
                          preferred_element_type=jnp.float32) + qkv_b_ref[l]
            att = jnp.zeros((T, H), jnp.float32)
            for h in range(nH):
                s0 = h * hd
                qh = qkv[:, s0:s0 + hd].astype(bf16)
                kh = qkv[:, H + s0:H + s0 + hd].astype(bf16)
                vh = qkv[:, 2 * H + s0:2 * H + s0 + hd].astype(bf16)
                sc = lax.dot_general(qh, kh, (((1,), (1,)), ((), ())),
                                     preferred_element_type=jnp.float32)
                sc = sc * scale + attn_bias
                sc = sc - jnp.max(sc, axis=-1, keepdims=True)
                p = jnp.exp(sc)
                p = p / jnp.sum(p, axis=-1, keepdims=True)   # exact (parity)
                oh = jnp.dot(p.astype(bf16), vh,
                             preferred_element_type=jnp.float32)
                # per-head output projection accumulated (no lane-axis concat)
                att = att + jnp.dot(oh.astype(bf16), o_w_ref[l, h],
                                    preferred_element_type=jnp.float32)
            att = att + o_b_ref[l]
            x = _layer_norm(xm + att, ln_g_ref[l, 0], ln_b_ref[l, 0])

            xm = x * mask
            f = conv1d_same(xm, f1w_ref[l]) + f1b_ref[l]
            f = jnp.maximum(f, 0.0)
            f = conv1d_same(f * mask, f2w_ref[l]) + f2b_ref[l]
            x = _layer_norm(x + f * mask, ln_g_ref[l, 1], ln_b_ref[l, 1])

        # trailing encoder `x * x_mask`
        xm = x * mask

        # ---- fused proj_m / proj_s (split in the wrapper) --------------------
        ms = (jnp.dot(xm.astype(bf16), pms_w_ref[...],
                      preferred_element_type=jnp.float32)
              + pms_b_ref[...]) * mask

        # ---- duration predictor (torch.detach == identity at inference) -----
        # TODO(synk): modules.Conv1DBlock source not provided; internals assumed
        # to be conv -> relu -> channel LayerNorm -> dropout(identity) on the
        # masked input, mirroring the original GlowTTS duration predictor.
        dp1p = dp1p_ref[...]   # (3, 1, Fdp): [bias, gamma, beta]
        dp2p = dp2p_ref[...]
        hdp = conv1d_same(xm, dp1w_ref[...]) + dp1p[0]
        hdp = _layer_norm(jnp.maximum(hdp, 0.0), dp1p[1], dp1p[2])
        hdp = conv1d_same(hdp * mask, dp2w_ref[...]) + dp2p[0]
        hdp = _layer_norm(jnp.maximum(hdp, 0.0), dp2p[1], dp2p[2])
        # NOTE: the provided DurationPredictor returns proj(x * x_mask) WITHOUT a
        # trailing * x_mask (unlike upstream glow-tts), so padded positions equal
        # the projection bias; we keep those exact spec semantics here.
        logw = (jnp.dot((hdp * mask).astype(bf16), dppw_ref[...],
                        preferred_element_type=jnp.float32) + dppb_ref[...])

        # ---- single lane-dense store: [proj_m | proj_s | logw | 0-pad] -------
        parts = [ms, logw]
        if OUT_W > 2 * O + 1:
            parts.append(jnp.zeros((T, OUT_W - 2 * O - 1), jnp.float32))
        out_ref[...] = jnp.concatenate(parts, axis=-1)

    return kernel


# ----------------------------------------------------------------------------
# parameter init (deterministic, synthetic; already in the fused layouts:
# QKV stacked along the output dim, conv weights stored (K, Cin, Cout) which is
# PyTorch conv.weight.permute(2, 1, 0))
# ----------------------------------------------------------------------------
def init_params(key, cfg):
    V = cfg["n_vocab"]; H = cfg["hidden_channels"]; F = cfg["filter_channels"]
    Fdp = cfg["filter_channels_dp"]; O = cfg["out_channels"]
    L = cfg["n_layers"]; K = cfg["kernel_size"]
    ks = iter(jax.random.split(key, 16))

    def nrm(shape, s=0.1):
        return s * jax.random.normal(next(ks), shape, jnp.float32)

    def dp_pack(c):  # [bias, gamma, beta] for a Conv1DBlock, shape (3, 1, c)
        return jnp.stack([jnp.zeros((1, c), jnp.float32),
                          jnp.ones((1, c), jnp.float32),
                          jnp.zeros((1, c), jnp.float32)], axis=0)

    return {
        "emb": nrm((V, H), H ** -0.5),
        "attn_qkv_w": nrm((L, H, 3 * H)),            # [Wq | Wk | Wv] fused
        "attn_qkv_b": jnp.zeros((L, 1, 3 * H), jnp.float32),
        "attn_o_w": nrm((L, H, H)),                  # output projection Wo
        "attn_o_b": jnp.zeros((L, 1, H), jnp.float32),
        "ln_g": jnp.ones((L, 2, 1, H), jnp.float32),  # [norm1, norm2]
        "ln_b": jnp.zeros((L, 2, 1, H), jnp.float32),
        "ffn_w1": nrm((L, K, H, F)),
        "ffn_b1": jnp.zeros((L, 1, F), jnp.float32),
        "ffn_w2": nrm((L, K, F, H)),
        "ffn_b2": jnp.zeros((L, 1, H), jnp.float32),
        "proj_ms_w": nrm((H, 2 * O)),                # proj_m | proj_s fused
        "proj_ms_b": jnp.zeros((1, 2 * O), jnp.float32),
        "dp1_w": nrm((K, H, Fdp)),
        "dp1_p": dp_pack(Fdp),
        "dp2_w": nrm((K, Fdp, Fdp)),
        "dp2_p": dp_pack(Fdp),
        "dpp_w": nrm((Fdp, 1)),
        "dpp_b": jnp.zeros((1, 1), jnp.float32),
    }


# ----------------------------------------------------------------------------
# full forward: ONE pallas_call with grid=(B,) (batch-parallel across TCs),
# plus trivial reshapes/transposes outside the kernel
# ----------------------------------------------------------------------------
def text_encoder_forward(tokens, lengths, params, cfg):
    B, T = tokens.shape
    O = cfg["out_channels"]; H = cfg["hidden_channels"]; nH = cfg["n_heads"]
    L = cfg["n_layers"]; K = cfg["kernel_size"]
    F = cfg["filter_channels"]; Fdp = cfg["filter_channels_dp"]
    hd = H // nH
    OUT_W = _round_up(2 * O + 1, 128)   # lane-dense combined output width
    bf16 = jnp.bfloat16

    # pack weights for the kernel: bf16 matmul operands, fused/flattened layouts
    emb = params["emb"].astype(bf16)
    qkv_w = params["attn_qkv_w"].astype(bf16)
    o_w = params["attn_o_w"].reshape(L, nH, hd, H).astype(bf16)   # per-head Wo
    ffn1_w = params["ffn_w1"].reshape(L, K * H, F).astype(bf16)
    ffn2_w = params["ffn_w2"].reshape(L, K * F, H).astype(bf16)
    dp1_w = params["dp1_w"].reshape(K * H, Fdp).astype(bf16)
    dp2_w = params["dp2_w"].reshape(K * Fdp, Fdp).astype(bf16)
    pms_w = params["proj_ms_w"].astype(bf16)
    dpp_w = params["dpp_w"].astype(bf16)

    kernel = make_text_encoder_kernel(cfg, T, OUT_W)

    vmem = pl.BlockSpec(memory_space=pltpu.MemorySpace.VMEM)
    smem = pl.BlockSpec(memory_space=pltpu.MemorySpace.SMEM)

    args = (lengths.astype(jnp.int32),
            tokens.reshape(B, T, 1).astype(jnp.int32),
            emb,
            qkv_w, params["attn_qkv_b"], o_w, params["attn_o_b"],
            params["ln_g"], params["ln_b"],
            ffn1_w, params["ffn_b1"], ffn2_w, params["ffn_b2"],
            pms_w, params["proj_ms_b"],
            dp1_w, params["dp1_p"], dp2_w, params["dp2_p"],
            dpp_w, params["dpp_b"])
    in_specs = [smem,
                pl.BlockSpec((None, T, 1), lambda b: (b, 0, 0))] \
               + [vmem] * (len(args) - 2)

    out = pl.pallas_call(
        kernel,
        grid=(B,),
        out_shape=jax.ShapeDtypeStruct((B, T, OUT_W), jnp.float32),
        in_specs=in_specs,
        out_specs=pl.BlockSpec((None, T, OUT_W), lambda b: (b, 0, 0)),
        compiler_params=pltpu.CompilerParams(
            dimension_semantics=("parallel",),
            vmem_limit_bytes=32 * 1024 * 1024),
    )(*args)

    # back to PyTorch NCT layout (tiny post-ops outside the kernel)
    x_m = jnp.transpose(out[:, :, :O], (0, 2, 1))                  # (B, O, T)
    x_logs = jnp.transpose(out[:, :, O:2 * O], (0, 2, 1))          # (B, O, T)
    logw = jnp.transpose(out[:, :, 2 * O:2 * O + 1], (0, 2, 1))    # (B, 1, T)
    x_mask = (jnp.arange(T)[None, None, :]
              < lengths[:, None, None]).astype(jnp.float32)        # (B, 1, T)
    return x_m, x_logs, logw, x_mask


if __name__ == "__main__":
    cfg = dict(
        n_vocab=40,
        out_channels=16,
        hidden_channels=32,
        filter_channels=64,
        filter_channels_dp=64,
        n_heads=2,
        n_layers=2,
        kernel_size=3,
        p_dropout=0.1,  # inference: dropout is identity
    )
    B, T = 2, 16

    key = jax.random.PRNGKey(0)
    k_tok, k_par = jax.random.split(key)
    tokens = jax.random.randint(k_tok, (B, T), 0, cfg["n_vocab"], dtype=jnp.int32)
    lengths = jnp.array([16, 11], dtype=jnp.int32)
    params = init_params(k_par, cfg)

    fwd = jax.jit(lambda tok, ln, p: text_encoder_forward(tok, ln, p, cfg))
    outs = jax.block_until_ready(fwd(tokens, lengths, params))
    x_m, x_logs, logw, x_mask = outs

    assert x_m.shape == (B, cfg["out_channels"], T)
    assert x_logs.shape == (B, cfg["out_channels"], T)
    assert logw.shape == (B, 1, T)
    assert x_mask.shape == (B, 1, T)
    assert all(bool(jnp.all(jnp.isfinite(o))) for o in (x_m, x_logs, logw, x_mask))
    # masked (padded) positions of x_m / x_logs must be exactly zero
    # (logw is intentionally NOT re-masked, matching the provided module).
    assert bool(jnp.all(x_m[1, :, int(lengths[1]):] == 0.0))
    assert bool(jnp.all(x_logs[1, :, int(lengths[1]):] == 0.0))
    print("KERNEL_OK")
</pallas_src>

<mosaic_0001>
module attributes {stable_mosaic.version = 11 : i64} {
  func.func @kernel(%arg0: i32, %arg1: memref<2xi32, #tpu.memory_space<smem>>, %arg2: memref<1x16x1xi32, #tpu.memory_space<vmem>>, %arg3: memref<40x32xbf16, #tpu.memory_space<vmem>>, %arg4: memref<2x32x96xbf16, #tpu.memory_space<vmem>>, %arg5: memref<2x1x96xf32, #tpu.memory_space<vmem>>, %arg6: memref<2x2x16x32xbf16, #tpu.memory_space<vmem>>, %arg7: memref<2x1x32xf32, #tpu.memory_space<vmem>>, %arg8: memref<2x2x1x32xf32, #tpu.memory_space<vmem>>, %arg9: memref<2x2x1x32xf32, #tpu.memory_space<vmem>>, %arg10: memref<2x96x64xbf16, #tpu.memory_space<vmem>>, %arg11: memref<2x1x64xf32, #tpu.memory_space<vmem>>, %arg12: memref<2x192x32xbf16, #tpu.memory_space<vmem>>, %arg13: memref<2x1x32xf32, #tpu.memory_space<vmem>>, %arg14: memref<32x32xbf16, #tpu.memory_space<vmem>>, %arg15: memref<1x32xf32, #tpu.memory_space<vmem>>, %arg16: memref<96x64xbf16, #tpu.memory_space<vmem>>, %arg17: memref<3x1x64xf32, #tpu.memory_space<vmem>>, %arg18: memref<192x64xbf16, #tpu.memory_space<vmem>>, %arg19: memref<3x1x64xf32, #tpu.memory_space<vmem>>, %arg20: memref<64x1xbf16, #tpu.memory_space<vmem>>, %arg21: memref<1x1xf32, #tpu.memory_space<vmem>>, %arg22: memref<1x16x128xf32, #tpu.memory_space<vmem>>) attributes {dimension_semantics = [#tpu.dimension_semantics<parallel>], iteration_bounds = array<i64: 2>, scalar_prefetch = 0 : i64, scratch_operands = 0 : i64, tpu.core_type = #tpu.core_type<tc>, window_params = [{transform_indices = @transform_0, window_bounds = array<i64: 2>}, {transform_indices = @transform_1, window_bounds = array<i64: 1, 16, 1>}, {pipeline_mode = #tpu.pipeline_mode<synchronous>, transform_indices = @transform_2, window_bounds = array<i64: 40, 32>}, {pipeline_mode = #tpu.pipeline_mode<synchronous>, transform_indices = @transform_3, window_bounds = array<i64: 2, 32, 96>}, {pipeline_mode = #tpu.pipeline_mode<synchronous>, transform_indices = @transform_4, window_bounds = array<i64: 2, 1, 96>}, {pipeline_mode = #tpu.pipeline_mode<synchronous>, transform_indices = @transform_5, window_bounds = array<i64: 2, 2, 16, 32>}, {pipeline_mode = #tpu.pipeline_mode<synchronous>, transform_indices = @transform_6, window_bounds = array<i64: 2, 1, 32>}, {pipeline_mode = #tpu.pipeline_mode<synchronous>, transform_indices = @transform_7, window_bounds = array<i64: 2, 2, 1, 32>}, {pipeline_mode = #tpu.pipeline_mode<synchronous>, transform_indices = @transform_8, window_bounds = array<i64: 2, 2, 1, 32>}, {pipeline_mode = #tpu.pipeline_mode<synchronous>, transform_indices = @transform_9, window_bounds = array<i64: 2, 96, 64>}, {pipeline_mode = #tpu.pipeline_mode<synchronous>, transform_indices = @transform_10, window_bounds = array<i64: 2, 1, 64>}, {pipeline_mode = #tpu.pipeline_mode<synchronous>, transform_indices = @transform_11, window_bounds = array<i64: 2, 192, 32>}, {pipeline_mode = #tpu.pipeline_mode<synchronous>, transform_indices = @transform_12, window_bounds = array<i64: 2, 1, 32>}, {pipeline_mode = #tpu.pipeline_mode<synchronous>, transform_indices = @transform_13, window_bounds = array<i64: 32, 32>}, {pipeline_mode = #tpu.pipeline_mode<synchronous>, transform_indices = @transform_14, window_bounds = array<i64: 1, 32>}, {pipeline_mode = #tpu.pipeline_mode<synchronous>, transform_indices = @transform_15, window_bounds = array<i64: 96, 64>}, {pipeline_mode = #tpu.pipeline_mode<synchronous>, transform_indices = @transform_16, window_bounds = array<i64: 3, 1, 64>}, {pipeline_mode = #tpu.pipeline_mode<synchronous>, transform_indices = @transform_17, window_bounds = array<i64: 192, 64>}, {pipeline_mode = #tpu.pipeline_mode<synchronous>, transform_indices = @transform_18, window_bounds = array<i64: 3, 1, 64>}, {pipeline_mode = #tpu.pipeline_mode<synchronous>, transform_indices = @transform_19, window_bounds = array<i64: 64, 1>}, {pipeline_mode = #tpu.pipeline_mode<synchronous>, transform_indices = @transform_20, window_bounds = array<i64: 1, 1>}, {transform_indices = @transform_21, window_bounds = array<i64: 1, 16, 128>}]} {
    %0 = arith.index_cast %arg0 : i32 to index
    %1 = memref.load %arg1[%0] : memref<2xi32, #tpu.memory_space<smem>>
    %2 = tpu.iota {dimensions = array<i32: 0>} : vector<16x1xi32>
    %3 = tpu.iota {dimensions = array<i32: 1>} : vector<1x16xi32>
    %4 = vector.broadcast %1 : i32 to vector<16x1xi32>
    %5 = arith.cmpi slt, %2, %4 : vector<16x1xi32>
    %6 = arith.extui %5 : vector<16x1xi1> to vector<16x1xi32>
    %7 = arith.sitofp %6 : vector<16x1xi32> to vector<16x1xf32>
    %8 = vector.broadcast %1 : i32 to vector<1x16xi32>
    %9 = arith.cmpi slt, %3, %8 : vector<1x16xi32>
    %10 = vector.broadcast %5 : vector<16x1xi1> to vector<16x16xi1>
    %11 = vector.broadcast %9 : vector<1x16xi1> to vector<16x16xi1>
    %12 = arith.andi %10, %11 : vector<16x16xi1>
    %cst = arith.constant 0.000000e+00 : f32
    %cst_0 = arith.constant -1.000000e+04 : f32
    %13 = vector.broadcast %cst : f32 to vector<16x16xf32>
    %14 = vector.broadcast %cst_0 : f32 to vector<16x16xf32>
    %15 = arith.select %12, %13, %14 : vector<16x16xi1>, vector<16x16xf32>
    %c1_i32 = arith.constant 1 : i32
    %16 = vector.broadcast %c1_i32 : i32 to vector<16x1xi32>
    %17 = arith.cmpi sge, %2, %16 : vector<16x1xi32>
    %c16_i32 = arith.constant 16 : i32
    %18 = vector.broadcast %c16_i32 : i32 to vector<16x1xi32>
    %19 = arith.cmpi slt, %2, %18 : vector<16x1xi32>
    %20 = arith.andi %17, %19 : vector<16x1xi1>
    %21 = arith.extui %20 : vector<16x1xi1> to vector<16x1xi32>
    %22 = arith.sitofp %21 : vector<16x1xi32> to vector<16x1xf32>
    %c0_i32 = arith.constant 0 : i32
    %23 = vector.broadcast %c0_i32 : i32 to vector<16x1xi32>
    %24 = arith.cmpi sge, %2, %23 : vector<16x1xi32>
    %c15_i32 = arith.constant 15 : i32
    %25 = vector.broadcast %c15_i32 : i32 to vector<16x1xi32>
    %26 = arith.cmpi slt, %2, %25 : vector<16x1xi32>
    %27 = arith.andi %24, %26 : vector<16x1xi1>
    %28 = arith.extui %27 : vector<16x1xi1> to vector<16x1xi32>
    %29 = arith.sitofp %28 : vector<16x1xi32> to vector<16x1xf32>
    %c0 = arith.constant 0 : index
    %c0_1 = arith.constant 0 : index
    %c0_2 = arith.constant 0 : index
    %30 = vector.load %arg2[%c0, %c0_1, %c0_2] : memref<1x16x1xi32, #tpu.memory_space<vmem>>, vector<1x16x1xi32>
    %31 = vector.shape_cast %30 : vector<1x16x1xi32> to vector<16x1xi32>
    %32 = tpu.iota {dimensions = array<i32: 1>} : vector<16x40xi32>
    %33 = vector.broadcast %31 : vector<16x1xi32> to vector<16x40xi32>
    %34 = arith.cmpi eq, %33, %32 : vector<16x40xi32>
    %35 = arith.extui %34 : vector<16x40xi1> to vector<16x40xi32>
    %36 = arith.sitofp %35 : vector<16x40xi32> to vector<16x40xf32>
    %37 = arith.truncf %36 : vector<16x40xf32> to vector<16x40xbf16>
    %c0_3 = arith.constant 0 : index
    %c0_4 = arith.constant 0 : index
    %38 = vector.load %arg3[%c0_3, %c0_4] : memref<40x32xbf16, #tpu.memory_space<vmem>>, vector<40x32xbf16>
    %cst_5 = arith.constant dense<0.000000e+00> : vector<16x32xf32>
    %39 = tpu.matmul %37, %38, %cst_5 {dimension_numbers = #tpu.dot_dimension_numbers<[1], [0], [0], [1], [0, 0, 1, 1], [], []>} : vector<16x40xbf16>, vector<40x32xbf16>, vector<16x32xf32> -> vector<16x32xf32>
    %cst_6 = arith.constant 5.65685415 : f32
    %40 = vector.broadcast %cst_6 : f32 to vector<16x32xf32>
    %41 = arith.mulf %39, %40 : vector<16x32xf32>
    %42 = vector.broadcast %7 : vector<16x1xf32> to vector<16x32xf32>
    %43 = arith.mulf %41, %42 : vector<16x32xf32>
    %44 = arith.truncf %43 : vector<16x32xf32> to vector<16x32xbf16>
    %c0_7 = arith.constant 0 : index
    %c0_8 = arith.constant 0 : index
    %c0_9 = arith.constant 0 : index
    %45 = vector.load %arg4[%c0_7, %c0_8, %c0_9] : memref<2x32x96xbf16, #tpu.memory_space<vmem>>, vector<1x32x96xbf16>
    %46 = vector.shape_cast %45 : vector<1x32x96xbf16> to vector<32x96xbf16>
    %cst_10 = arith.constant dense<0.000000e+00> : vector<16x96xf32>
    %47 = tpu.matmul %44, %46, %cst_10 {dimension_numbers = #tpu.dot_dimension_numbers<[1], [0], [0], [1], [0, 0, 1, 1], [], []>} : vector<16x32xbf16>, vector<32x96xbf16>, vector<16x96xf32> -> vector<16x96xf32>
    %c0_11 = arith.constant 0 : index
    %c0_12 = arith.constant 0 : index
    %c0_13 = arith.constant 0 : index
    %48 = vector.load %arg5[%c0_11, %c0_12, %c0_13] : memref<2x1x96xf32, #tpu.memory_space<vmem>>, vector<1x1x96xf32>
    %49 = vector.shape_cast %48 : vector<1x1x96xf32> to vector<1x96xf32>
    %50 = vector.broadcast %49 : vector<1x96xf32> to vector<16x96xf32>
    %51 = arith.addf %47, %50 : vector<16x96xf32>
    %cst_14 = arith.constant 0.000000e+00 : f32
    %52 = vector.broadcast %cst_14 : f32 to vector<16x32xf32>
    %53 = vector.extract_strided_slice %51 {offsets = [0, 0], sizes = [16, 16], strides = [1, 1]} : vector<16x96xf32> to vector<16x16xf32>
    %54 = arith.truncf %53 : vector<16x16xf32> to vector<16x16xbf16>
    %55 = vector.extract_strided_slice %51 {offsets = [0, 32], sizes = [16, 16], strides = [1, 1]} : vector<16x96xf32> to vector<16x16xf32>
    %56 = arith.truncf %55 : vector<16x16xf32> to vector<16x16xbf16>
    %57 = vector.extract_strided_slice %51 {offsets = [0, 64], sizes = [16, 16], strides = [1, 1]} : vector<16x96xf32> to vector<16x16xf32>
    %58 = arith.truncf %57 : vector<16x16xf32> to vector<16x16xbf16>
    %cst_15 = arith.constant dense<0.000000e+00> : vector<16x16xf32>
    %59 = tpu.matmul %54, %56, %cst_15 {dimension_numbers = #tpu.dot_dimension_numbers<[1], [1], [0], [0], [0, 0, 1, 0], [], []>} : vector<16x16xbf16>, vector<16x16xbf16>, vector<16x16xf32> -> vector<16x16xf32>
    %cst_16 = arith.constant 2.500000e-01 : f32
    %60 = vector.broadcast %cst_16 : f32 to vector<16x16xf32>
    %61 = arith.mulf %59, %60 : vector<16x16xf32>
    %62 = arith.addf %61, %15 : vector<16x16xf32>
    %cst_17 = arith.constant dense<0xFF800000> : vector<16xf32>
    %63 = vector.multi_reduction <maximumf>, %62, %cst_17 [1] : vector<16x16xf32> to vector<16xf32>
    %64 = vector.shape_cast %63 : vector<16xf32> to vector<16x1xf32>
    %65 = vector.broadcast %64 : vector<16x1xf32> to vector<16x16xf32>
    %66 = arith.subf %62, %65 : vector<16x16xf32>
    %67 = math.exp %66 : vector<16x16xf32>
    %cst_18 = arith.constant dense<0.000000e+00> : vector<16xf32>
    %68 = vector.multi_reduction <add>, %67, %cst_18 [1] : vector<16x16xf32> to vector<16xf32>
    %69 = vector.shape_cast %68 : vector<16xf32> to vector<16x1xf32>
    %70 = vector.broadcast %69 : vector<16x1xf32> to vector<16x16xf32>
    %71 = arith.divf %67, %70 : vector<16x16xf32>
    %72 = arith.truncf %71 : vector<16x16xf32> to vector<16x16xbf16>
    %cst_19 = arith.constant dense<0.000000e+00> : vector<16x16xf32>
    %73 = tpu.matmul %72, %58, %cst_19 {dimension_numbers = #tpu.dot_dimension_numbers<[1], [0], [0], [1], [0, 0, 1, 1], [], []>} : vector<16x16xbf16>, vector<16x16xbf16>, vector<16x16xf32> -> vector<16x16xf32>
    %74 = arith.truncf %73 : vector<16x16xf32> to vector<16x16xbf16>
    %c0_20 = arith.constant 0 : index
    %c0_21 = arith.constant 0 : index
    %c0_22 = arith.constant 0 : index
    %c0_23 = arith.constant 0 : index
    %75 = vector.load %arg6[%c0_20, %c0_21, %c0_22, %c0_23] : memref<2x2x16x32xbf16, #tpu.memory_space<vmem>>, vector<1x1x16x32xbf16>
    %76 = vector.shape_cast %75 : vector<1x1x16x32xbf16> to vector<16x32xbf16>
    %cst_24 = arith.constant dense<0.000000e+00> : vector<16x32xf32>
    %77 = tpu.matmul %74, %76, %cst_24 {dimension_numbers = #tpu.dot_dimension_numbers<[1], [0], [0], [1], [0, 0, 1, 1], [], []>} : vector<16x16xbf16>, vector<16x32xbf16>, vector<16x32xf32> -> vector<16x32xf32>
    %78 = arith.addf %52, %77 : vector<16x32xf32>
    %79 = vector.extract_strided_slice %51 {offsets = [0, 16], sizes = [16, 16], strides = [1, 1]} : vector<16x96xf32> to vector<16x16xf32>
    %80 = arith.truncf %79 : vector<16x16xf32> to vector<16x16xbf16>
    %81 = vector.extract_strided_slice %51 {offsets = [0, 48], sizes = [16, 16], strides = [1, 1]} : vector<16x96xf32> to vector<16x16xf32>
    %82 = arith.truncf %81 : vector<16x16xf32> to vector<16x16xbf16>
    %83 = vector.extract_strided_slice %51 {offsets = [0, 80], sizes = [16, 16], strides = [1, 1]} : vector<16x96xf32> to vector<16x16xf32>
    %84 = arith.truncf %83 : vector<16x16xf32> to vector<16x16xbf16>
    %cst_25 = arith.constant dense<0.000000e+00> : vector<16x16xf32>
    %85 = tpu.matmul %80, %82, %cst_25 {dimension_numbers = #tpu.dot_dimension_numbers<[1], [1], [0], [0], [0, 0, 1, 0], [], []>} : vector<16x16xbf16>, vector<16x16xbf16>, vector<16x16xf32> -> vector<16x16xf32>
    %cst_26 = arith.constant 2.500000e-01 : f32
    %86 = vector.broadcast %cst_26 : f32 to vector<16x16xf32>
    %87 = arith.mulf %85, %86 : vector<16x16xf32>
    %88 = arith.addf %87, %15 : vector<16x16xf32>
    %cst_27 = arith.constant dense<0xFF800000> : vector<16xf32>
    %89 = vector.multi_reduction <maximumf>, %88, %cst_27 [1] : vector<16x16xf32> to vector<16xf32>
    %90 = vector.shape_cast %89 : vector<16xf32> to vector<16x1xf32>
    %91 = vector.broadcast %90 : vector<16x1xf32> to vector<16x16xf32>
    %92 = arith.subf %88, %91 : vector<16x16xf32>
    %93 = math.exp %92 : vector<16x16xf32>
    %cst_28 = arith.constant dense<0.000000e+00> : vector<16xf32>
    %94 = vector.multi_reduction <add>, %93, %cst_28 [1] : vector<16x16xf32> to vector<16xf32>
    %95 = vector.shape_cast %94 : vector<16xf32> to vector<16x1xf32>
    %96 = vector.broadcast %95 : vector<16x1xf32> to vector<16x16xf32>
    %97 = arith.divf %93, %96 : vector<16x16xf32>
    %98 = arith.truncf %97 : vector<16x16xf32> to vector<16x16xbf16>
    %cst_29 = arith.constant dense<0.000000e+00> : vector<16x16xf32>
    %99 = tpu.matmul %98, %84, %cst_29 {dimension_numbers = #tpu.dot_dimension_numbers<[1], [0], [0], [1], [0, 0, 1, 1], [], []>} : vector<16x16xbf16>, vector<16x16xbf16>, vector<16x16xf32> -> vector<16x16xf32>
    %100 = arith.truncf %99 : vector<16x16xf32> to vector<16x16xbf16>
    %c0_30 = arith.constant 0 : index
    %c1 = arith.constant 1 : index
    %c0_31 = arith.constant 0 : index
    %c0_32 = arith.constant 0 : index
    %101 = vector.load %arg6[%c0_30, %c1, %c0_31, %c0_32] : memref<2x2x16x32xbf16, #tpu.memory_space<vmem>>, vector<1x1x16x32xbf16>
    %102 = vector.shape_cast %101 : vector<1x1x16x32xbf16> to vector<16x32xbf16>
    %cst_33 = arith.constant dense<0.000000e+00> : vector<16x32xf32>
    %103 = tpu.matmul %100, %102, %cst_33 {dimension_numbers = #tpu.dot_dimension_numbers<[1], [0], [0], [1], [0, 0, 1, 1], [], []>} : vector<16x16xbf16>, vector<16x32xbf16>, vector<16x32xf32> -> vector<16x32xf32>
    %104 = arith.addf %78, %103 : vector<16x32xf32>
    %c0_34 = arith.constant 0 : index
    %c0_35 = arith.constant 0 : index
    %c0_36 = arith.constant 0 : index
    %105 = vector.load %arg7[%c0_34, %c0_35, %c0_36] : memref<2x1x32xf32, #tpu.memory_space<vmem>>, vector<1x1x32xf32>
    %106 = vector.shape_cast %105 : vector<1x1x32xf32> to vector<1x32xf32>
    %107 = vector.broadcast %106 : vector<1x32xf32> to vector<16x32xf32>
    %108 = arith.addf %104, %107 : vector<16x32xf32>
    %109 = arith.addf %43, %108 : vector<16x32xf32>
    %c0_37 = arith.constant 0 : index
    %c0_38 = arith.constant 0 : index
    %c0_39 = arith.constant 0 : index
    %c0_40 = arith.constant 0 : index
    %110 = vector.load %arg8[%c0_37, %c0_38, %c0_39, %c0_40] : memref<2x2x1x32xf32, #tpu.memory_space<vmem>>, vector<1x1x1x32xf32>
    %111 = vector.shape_cast %110 : vector<1x1x1x32xf32> to vector<1x32xf32>
    %c0_41 = arith.constant 0 : index
    %c0_42 = arith.constant 0 : index
    %c0_43 = arith.constant 0 : index
    %c0_44 = arith.constant 0 : index
    %112 = vector.load %arg9[%c0_41, %c0_42, %c0_43, %c0_44] : memref<2x2x1x32xf32, #tpu.memory_space<vmem>>, vector<1x1x1x32xf32>
    %113 = vector.shape_cast %112 : vector<1x1x1x32xf32> to vector<1x32xf32>
    %cst_45 = arith.constant dense<0.000000e+00> : vector<16xf32>
    %114 = vector.multi_reduction <add>, %109, %cst_45 [1] : vector<16x32xf32> to vector<16xf32>
    %115 = vector.shape_cast %114 : vector<16xf32> to vector<16x1xf32>
    %cst_46 = arith.constant 3.200000e+01 : f32
    %116 = vector.broadcast %cst_46 : f32 to vector<16x1xf32>
    %117 = arith.divf %115, %116 : vector<16x1xf32>
    %118 = vector.broadcast %117 : vector<16x1xf32> to vector<16x32xf32>
    %119 = arith.subf %109, %118 : vector<16x32xf32>
    %120 = arith.mulf %119, %119 : vector<16x32xf32>
    %cst_47 = arith.constant dense<0.000000e+00> : vector<16xf32>
    %121 = vector.multi_reduction <add>, %120, %cst_47 [1] : vector<16x32xf32> to vector<16xf32>
    %122 = vector.shape_cast %121 : vector<16xf32> to vector<16x1xf32>
    %cst_48 = arith.constant 3.200000e+01 : f32
    %123 = vector.broadcast %cst_48 : f32 to vector<16x1xf32>
    %124 = arith.divf %122, %123 : vector<16x1xf32>
    %125 = vector.broadcast %117 : vector<16x1xf32> to vector<16x32xf32>
    %126 = arith.subf %109, %125 : vector<16x32xf32>
    %cst_49 = arith.constant 9.99999974E-5 : f32
    %127 = vector.broadcast %cst_49 : f32 to vector<16x1xf32>
    %128 = arith.addf %124, %127 : vector<16x1xf32>
    %129 = math.rsqrt %128 : vector<16x1xf32>
    %130 = vector.broadcast %129 : vector<16x1xf32> to vector<16x32xf32>
    %131 = arith.mulf %126, %130 : vector<16x32xf32>
    %132 = vector.broadcast %111 : vector<1x32xf32> to vector<16x32xf32>
    %133 = arith.mulf %131, %132 : vector<16x32xf32>
    %134 = vector.broadcast %113 : vector<1x32xf32> to vector<16x32xf32>
    %135 = arith.addf %133, %134 : vector<16x32xf32>
    %136 = vector.broadcast %7 : vector<16x1xf32> to vector<16x32xf32>
    %137 = arith.mulf %135, %136 : vector<16x32xf32>
    %c0_50 = arith.constant 0 : index
    %c0_51 = arith.constant 0 : index
    %c0_52 = arith.constant 0 : index
    %138 = vector.load %arg10[%c0_50, %c0_51, %c0_52] : memref<2x96x64xbf16, #tpu.memory_space<vmem>>, vector<1x96x64xbf16>
    %139 = vector.shape_cast %138 : vector<1x96x64xbf16> to vector<96x64xbf16>
    %c1_i32_53 = arith.constant 1 : i32
    %140 = tpu.dynamic_rotate %137 by %c1_i32_53 dim 0 : vector<16x32xf32>, i32 -> vector<16x32xf32>
    %141 = vector.broadcast %22 : vector<16x1xf32> to vector<16x32xf32>
    %142 = arith.mulf %140, %141 : vector<16x32xf32>
    %c15_i32_54 = arith.constant 15 : i32
    %143 = tpu.dynamic_rotate %137 by %c15_i32_54 dim 0 : vector<16x32xf32>, i32 -> vector<16x32xf32>
    %144 = vector.broadcast %29 : vector<16x1xf32> to vector<16x32xf32>
    %145 = arith.mulf %143, %144 : vector<16x32xf32>
    %146 = tpu.concatenate %142, %137, %145 in 1 : vector<16x32xf32>, vector<16x32xf32>, vector<16x32xf32> -> vector<16x96xf32>
    %147 = arith.truncf %146 : vector<16x96xf32> to vector<16x96xbf16>
    %cst_55 = arith.constant dense<0.000000e+00> : vector<16x64xf32>
    %148 = tpu.matmul %147, %139, %cst_55 {dimension_numbers = #tpu.dot_dimension_numbers<[1], [0], [0], [1], [0, 0, 1, 1], [], []>} : vector<16x96xbf16>, vector<96x64xbf16>, vector<16x64xf32> -> vector<16x64xf32>
    %c0_56 = arith.constant 0 : index
    %c0_57 = arith.constant 0 : index
    %c0_58 = arith.constant 0 : index
    %149 = vector.load %arg11[%c0_56, %c0_57, %c0_58] : memref<2x1x64xf32, #tpu.memory_space<vmem>>, vector<1x1x64xf32>
    %150 = vector.shape_cast %149 : vector<1x1x64xf32> to vector<1x64xf32>
    %151 = vector.broadcast %150 : vector<1x64xf32> to vector<16x64xf32>
    %152 = arith.addf %148, %151 : vector<16x64xf32>
    %cst_59 = arith.constant 0.000000e+00 : f32
    %153 = vector.broadcast %cst_59 : f32 to vector<16x64xf32>
    %154 = arith.maximumf %152, %153 : vector<16x64xf32>
    %155 = vector.broadcast %7 : vector<16x1xf32> to vector<16x64xf32>
    %156 = arith.mulf %154, %155 : vector<16x64xf32>
    %c0_60 = arith.constant 0 : index
    %c0_61 = arith.constant 0 : index
    %c0_62 = arith.constant 0 : index
    %157 = vector.load %arg12[%c0_60, %c0_61, %c0_62] : memref<2x192x32xbf16, #tpu.memory_space<vmem>>, vector<1x192x32xbf16>
    %158 = vector.shape_cast %157 : vector<1x192x32xbf16> to vector<192x32xbf16>
    %c1_i32_63 = arith.constant 1 : i32
    %159 = tpu.dynamic_rotate %156 by %c1_i32_63 dim 0 : vector<16x64xf32>, i32 -> vector<16x64xf32>
    %160 = vector.broadcast %22 : vector<16x1xf32> to vector<16x64xf32>
    %161 = arith.mulf %159, %160 : vector<16x64xf32>
    %c15_i32_64 = arith.constant 15 : i32
    %162 = tpu.dynamic_rotate %156 by %c15_i32_64 dim 0 : vector<16x64xf32>, i32 -> vector<16x64xf32>
    %163 = vector.broadcast %29 : vector<16x1xf32> to vector<16x64xf32>
    %164 = arith.mulf %162, %163 : vector<16x64xf32>
    %165 = tpu.concatenate %161, %156, %164 in 1 : vector<16x64xf32>, vector<16x64xf32>, vector<16x64xf32> -> vector<16x192xf32>
    %166 = arith.truncf %165 : vector<16x192xf32> to vector<16x192xbf16>
    %cst_65 = arith.constant dense<0.000000e+00> : vector<16x32xf32>
    %167 = tpu.matmul %166, %158, %cst_65 {dimension_numbers = #tpu.dot_dimension_numbers<[1], [0], [0], [1], [0, 0, 1, 1], [], []>} : vector<16x192xbf16>, vector<192x32xbf16>, vector<16x32xf32> -> vector<16x32xf32>
    %c0_66 = arith.constant 0 : index
    %c0_67 = arith.constant 0 : index
    %c0_68 = arith.constant 0 : index
    %168 = vector.load %arg13[%c0_66, %c0_67, %c0_68] : memref<2x1x32xf32, #tpu.memory_space<vmem>>, vector<1x1x32xf32>
    %169 = vector.shape_cast %168 : vector<1x1x32xf32> to vector<1x32xf32>
    %170 = vector.broadcast %169 : vector<1x32xf32> to vector<16x32xf32>
    %171 = arith.addf %167, %170 : vector<16x32xf32>
    %172 = vector.broadcast %7 : vector<16x1xf32> to vector<16x32xf32>
    %173 = arith.mulf %171, %172 : vector<16x32xf32>
    %174 = arith.addf %135, %173 : vector<16x32xf32>
    %c0_69 = arith.constant 0 : index
    %c1_70 = arith.constant 1 : index
    %c0_71 = arith.constant 0 : index
    %c0_72 = arith.constant 0 : index
    %175 = vector.load %arg8[%c0_69, %c1_70, %c0_71, %c0_72] : memref<2x2x1x32xf32, #tpu.memory_space<vmem>>, vector<1x1x1x32xf32>
    %176 = vector.shape_cast %175 : vector<1x1x1x32xf32> to vector<1x32xf32>
    %c0_73 = arith.constant 0 : index
    %c1_74 = arith.constant 1 : index
    %c0_75 = arith.constant 0 : index
    %c0_76 = arith.constant 0 : index
    %177 = vector.load %arg9[%c0_73, %c1_74, %c0_75, %c0_76] : memref<2x2x1x32xf32, #tpu.memory_space<vmem>>, vector<1x1x1x32xf32>
    %178 = vector.shape_cast %177 : vector<1x1x1x32xf32> to vector<1x32xf32>
    %cst_77 = arith.constant dense<0.000000e+00> : vector<16xf32>
    %179 = vector.multi_reduction <add>, %174, %cst_77 [1] : vector<16x32xf32> to vector<16xf32>
    %180 = vector.shape_cast %179 : vector<16xf32> to vector<16x1xf32>
    %cst_78 = arith.constant 3.200000e+01 : f32
    %181 = vector.broadcast %cst_78 : f32 to vector<16x1xf32>
    %182 = arith.divf %180, %181 : vector<16x1xf32>
    %183 = vector.broadcast %182 : vector<16x1xf32> to vector<16x32xf32>
    %184 = arith.subf %174, %183 : vector<16x32xf32>
    %185 = arith.mulf %184, %184 : vector<16x32xf32>
    %cst_79 = arith.constant dense<0.000000e+00> : vector<16xf32>
    %186 = vector.multi_reduction <add>, %185, %cst_79 [1] : vector<16x32xf32> to vector<16xf32>
    %187 = vector.shape_cast %186 : vector<16xf32> to vector<16x1xf32>
    %cst_80 = arith.constant 3.200000e+01 : f32
    %188 = vector.broadcast %cst_80 : f32 to vector<16x1xf32>
    %189 = arith.divf %187, %188 : vector<16x1xf32>
    %190 = vector.broadcast %182 : vector<16x1xf32> to vector<16x32xf32>
    %191 = arith.subf %174, %190 : vector<16x32xf32>
    %cst_81 = arith.constant 9.99999974E-5 : f32
    %192 = vector.broadcast %cst_81 : f32 to vector<16x1xf32>
    %193 = arith.addf %189, %192 : vector<16x1xf32>
    %194 = math.rsqrt %193 : vector<16x1xf32>
    %195 = vector.broadcast %194 : vector<16x1xf32> to vector<16x32xf32>
    %196 = arith.mulf %191, %195 : vector<16x32xf32>
    %197 = vector.broadcast %176 : vector<1x32xf32> to vector<16x32xf32>
    %198 = arith.mulf %196, %197 : vector<16x32xf32>
    %199 = vector.broadcast %178 : vector<1x32xf32> to vector<16x32xf32>
    %200 = arith.addf %198, %199 : vector<16x32xf32>
    %201 = vector.broadcast %7 : vector<16x1xf32> to vector<16x32xf32>
    %202 = arith.mulf %200, %201 : vector<16x32xf32>
    %203 = arith.truncf %202 : vector<16x32xf32> to vector<16x32xbf16>
    %c1_82 = arith.constant 1 : index
    %c0_83 = arith.constant 0 : index
    %c0_84 = arith.constant 0 : index
    %204 = vector.load %arg4[%c1_82, %c0_83, %c0_84] : memref<2x32x96xbf16, #tpu.memory_space<vmem>>, vector<1x32x96xbf16>
    %205 = vector.shape_cast %204 : vector<1x32x96xbf16> to vector<32x96xbf16>
    %cst_85 = arith.constant dense<0.000000e+00> : vector<16x96xf32>
    %206 = tpu.matmul %203, %205, %cst_85 {dimension_numbers = #tpu.dot_dimension_numbers<[1], [0], [0], [1], [0, 0, 1, 1], [], []>} : vector<16x32xbf16>, vector<32x96xbf16>, vector<16x96xf32> -> vector<16x96xf32>
    %c1_86 = arith.constant 1 : index
    %c0_87 = arith.constant 0 : index
    %c0_88 = arith.constant 0 : index
    %207 = vector.load %arg5[%c1_86, %c0_87, %c0_88] : memref<2x1x96xf32, #tpu.memory_space<vmem>>, vector<1x1x96xf32>
    %208 = vector.shape_cast %207 : vector<1x1x96xf32> to vector<1x96xf32>
    %209 = vector.broadcast %208 : vector<1x96xf32> to vector<16x96xf32>
    %210 = arith.addf %206, %209 : vector<16x96xf32>
    %cst_89 = arith.constant 0.000000e+00 : f32
    %211 = vector.broadcast %cst_89 : f32 to vector<16x32xf32>
    %212 = vector.extract_strided_slice %210 {offsets = [0, 0], sizes = [16, 16], strides = [1, 1]} : vector<16x96xf32> to vector<16x16xf32>
    %213 = arith.truncf %212 : vector<16x16xf32> to vector<16x16xbf16>
    %214 = vector.extract_strided_slice %210 {offsets = [0, 32], sizes = [16, 16], strides = [1, 1]} : vector<16x96xf32> to vector<16x16xf32>
    %215 = arith.truncf %214 : vector<16x16xf32> to vector<16x16xbf16>
    %216 = vector.extract_strided_slice %210 {offsets = [0, 64], sizes = [16, 16], strides = [1, 1]} : vector<16x96xf32> to vector<16x16xf32>
    %217 = arith.truncf %216 : vector<16x16xf32> to vector<16x16xbf16>
    %cst_90 = arith.constant dense<0.000000e+00> : vector<16x16xf32>
    %218 = tpu.matmul %213, %215, %cst_90 {dimension_numbers = #tpu.dot_dimension_numbers<[1], [1], [0], [0], [0, 0, 1, 0], [], []>} : vector<16x16xbf16>, vector<16x16xbf16>, vector<16x16xf32> -> vector<16x16xf32>
    %cst_91 = arith.constant 2.500000e-01 : f32
    %219 = vector.broadcast %cst_91 : f32 to vector<16x16xf32>
    %220 = arith.mulf %218, %219 : vector<16x16xf32>
    %221 = arith.addf %220, %15 : vector<16x16xf32>
    %cst_92 = arith.constant dense<0xFF800000> : vector<16xf32>
    %222 = vector.multi_reduction <maximumf>, %221, %cst_92 [1] : vector<16x16xf32> to vector<16xf32>
    %223 = vector.shape_cast %222 : vector<16xf32> to vector<16x1xf32>
    %224 = vector.broadcast %223 : vector<16x1xf32> to vector<16x16xf32>
    %225 = arith.subf %221, %224 : vector<16x16xf32>
    %226 = math.exp %225 : vector<16x16xf32>
    %cst_93 = arith.constant dense<0.000000e+00> : vector<16xf32>
    %227 = vector.multi_reduction <add>, %226, %cst_93 [1] : vector<16x16xf32> to vector<16xf32>
    %228 = vector.shape_cast %227 : vector<16xf32> to vector<16x1xf32>
    %229 = vector.broadcast %228 : vector<16x1xf32> to vector<16x16xf32>
    %230 = arith.divf %226, %229 : vector<16x16xf32>
    %231 = arith.truncf %230 : vector<16x16xf32> to vector<16x16xbf16>
    %cst_94 = arith.constant dense<0.000000e+00> : vector<16x16xf32>
    %232 = tpu.matmul %231, %217, %cst_94 {dimension_numbers = #tpu.dot_dimension_numbers<[1], [0], [0], [1], [0, 0, 1, 1], [], []>} : vector<16x16xbf16>, vector<16x16xbf16>, vector<16x16xf32> -> vector<16x16xf32>
    %233 = arith.truncf %232 : vector<16x16xf32> to vector<16x16xbf16>
    %c1_95 = arith.constant 1 : index
    %c0_96 = arith.constant 0 : index
    %c0_97 = arith.constant 0 : index
    %c0_98 = arith.constant 0 : index
    %234 = vector.load %arg6[%c1_95, %c0_96, %c0_97, %c0_98] : memref<2x2x16x32xbf16, #tpu.memory_space<vmem>>, vector<1x1x16x32xbf16>
    %235 = vector.shape_cast %234 : vector<1x1x16x32xbf16> to vector<16x32xbf16>
    %cst_99 = arith.constant dense<0.000000e+00> : vector<16x32xf32>
    %236 = tpu.matmul %233, %235, %cst_99 {dimension_numbers = #tpu.dot_dimension_numbers<[1], [0], [0], [1], [0, 0, 1, 1], [], []>} : vector<16x16xbf16>, vector<16x32xbf16>, vector<16x32xf32> -> vector<16x32xf32>
    %237 = arith.addf %211, %236 : vector<16x32xf32>
    %238 = vector.extract_strided_slice %210 {offsets = [0, 16], sizes = [16, 16], strides = [1, 1]} : vector<16x96xf32> to vector<16x16xf32>
    %239 = arith.truncf %238 : vector<16x16xf32> to vector<16x16xbf16>
    %240 = vector.extract_strided_slice %210 {offsets = [0, 48], sizes = [16, 16], strides = [1, 1]} : vector<16x96xf32> to vector<16x16xf32>
    %241 = arith.truncf %240 : vector<16x16xf32> to vector<16x16xbf16>
    %242 = vector.extract_strided_slice %210 {offsets = [0, 80], sizes = [16, 16], strides = [1, 1]} : vector<16x96xf32> to vector<16x16xf32>
    %243 = arith.truncf %242 : vector<16x16xf32> to vector<16x16xbf16>
    %cst_100 = arith.constant dense<0.000000e+00> : vector<16x16xf32>
    %244 = tpu.matmul %239, %241, %cst_100 {dimension_numbers = #tpu.dot_dimension_numbers<[1], [1], [0], [0], [0, 0, 1, 0], [], []>} : vector<16x16xbf16>, vector<16x16xbf16>, vector<16x16xf32> -> vector<16x16xf32>
    %cst_101 = arith.constant 2.500000e-01 : f32
    %245 = vector.broadcast %cst_101 : f32 to vector<16x16xf32>
    %246 = arith.mulf %244, %245 : vector<16x16xf32>
    %247 = arith.addf %246, %15 : vector<16x16xf32>
    %cst_102 = arith.constant dense<0xFF800000> : vector<16xf32>
    %248 = vector.multi_reduction <maximumf>, %247, %cst_102 [1] : vector<16x16xf32> to vector<16xf32>
    %249 = vector.shape_cast %248 : vector<16xf32> to vector<16x1xf32>
    %250 = vector.broadcast %249 : vector<16x1xf32> to vector<16x16xf32>
    %251 = arith.subf %247, %250 : vector<16x16xf32>
    %252 = math.exp %251 : vector<16x16xf32>
    %cst_103 = arith.constant dense<0.000000e+00> : vector<16xf32>
    %253 = vector.multi_reduction <add>, %252, %cst_103 [1] : vector<16x16xf32> to vector<16xf32>
    %254 = vector.shape_cast %253 : vector<16xf32> to vector<16x1xf32>
    %255 = vector.broadcast %254 : vector<16x1xf32> to vector<16x16xf32>
    %256 = arith.divf %252, %255 : vector<16x16xf32>
    %257 = arith.truncf %256 : vector<16x16xf32> to vector<16x16xbf16>
    %cst_104 = arith.constant dense<0.000000e+00> : vector<16x16xf32>
    %258 = tpu.matmul %257, %243, %cst_104 {dimension_numbers = #tpu.dot_dimension_numbers<[1], [0], [0], [1], [0, 0, 1, 1], [], []>} : vector<16x16xbf16>, vector<16x16xbf16>, vector<16x16xf32> -> vector<16x16xf32>
    %259 = arith.truncf %258 : vector<16x16xf32> to vector<16x16xbf16>
    %c1_105 = arith.constant 1 : index
    %c1_106 = arith.constant 1 : index
    %c0_107 = arith.constant 0 : index
    %c0_108 = arith.constant 0 : index
    %260 = vector.load %arg6[%c1_105, %c1_106, %c0_107, %c0_108] : memref<2x2x16x32xbf16, #tpu.memory_space<vmem>>, vector<1x1x16x32xbf16>
    %261 = vector.shape_cast %260 : vector<1x1x16x32xbf16> to vector<16x32xbf16>
    %cst_109 = arith.constant dense<0.000000e+00> : vector<16x32xf32>
    %262 = tpu.matmul %259, %261, %cst_109 {dimension_numbers = #tpu.dot_dimension_numbers<[1], [0], [0], [1], [0, 0, 1, 1], [], []>} : vector<16x16xbf16>, vector<16x32xbf16>, vector<16x32xf32> -> vector<16x32xf32>
    %263 = arith.addf %237, %262 : vector<16x32xf32>
    %c1_110 = arith.constant 1 : index
    %c0_111 = arith.constant 0 : index
    %c0_112 = arith.constant 0 : index
    %264 = vector.load %arg7[%c1_110, %c0_111, %c0_112] : memref<2x1x32xf32, #tpu.memory_space<vmem>>, vector<1x1x32xf32>
    %265 = vector.shape_cast %264 : vector<1x1x32xf32> to vector<1x32xf32>
    %266 = vector.broadcast %265 : vector<1x32xf32> to vector<16x32xf32>
    %267 = arith.addf %263, %266 : vector<16x32xf32>
    %268 = arith.addf %202, %267 : vector<16x32xf32>
    %c1_113 = arith.constant 1 : index
    %c0_114 = arith.constant 0 : index
    %c0_115 = arith.constant 0 : index
    %c0_116 = arith.constant 0 : index
    %269 = vector.load %arg8[%c1_113, %c0_114, %c0_115, %c0_116] : memref<2x2x1x32xf32, #tpu.memory_space<vmem>>, vector<1x1x1x32xf32>
    %270 = vector.shape_cast %269 : vector<1x1x1x32xf32> to vector<1x32xf32>
    %c1_117 = arith.constant 1 : index
    %c0_118 = arith.constant 0 : index
    %c0_119 = arith.constant 0 : index
    %c0_120 = arith.constant 0 : index
    %271 = vector.load %arg9[%c1_117, %c0_118, %c0_119, %c0_120] : memref<2x2x1x32xf32, #tpu.memory_space<vmem>>, vector<1x1x1x32xf32>
    %272 = vector.shape_cast %271 : vector<1x1x1x32xf32> to vector<1x32xf32>
    %cst_121 = arith.constant dense<0.000000e+00> : vector<16xf32>
    %273 = vector.multi_reduction <add>, %268, %cst_121 [1] : vector<16x32xf32> to vector<16xf32>
    %274 = vector.shape_cast %273 : vector<16xf32> to vector<16x1xf32>
    %cst_122 = arith.constant 3.200000e+01 : f32
    %275 = vector.broadcast %cst_122 : f32 to vector<16x1xf32>
    %276 = arith.divf %274, %275 : vector<16x1xf32>
    %277 = vector.broadcast %276 : vector<16x1xf32> to vector<16x32xf32>
    %278 = arith.subf %268, %277 : vector<16x32xf32>
    %279 = arith.mulf %278, %278 : vector<16x32xf32>
    %cst_123 = arith.constant dense<0.000000e+00> : vector<16xf32>
    %280 = vector.multi_reduction <add>, %279, %cst_123 [1] : vector<16x32xf32> to vector<16xf32>
    %281 = vector.shape_cast %280 : vector<16xf32> to vector<16x1xf32>
    %cst_124 = arith.constant 3.200000e+01 : f32
    %282 = vector.broadcast %cst_124 : f32 to vector<16x1xf32>
    %283 = arith.divf %281, %282 : vector<16x1xf32>
    %284 = vector.broadcast %276 : vector<16x1xf32> to vector<16x32xf32>
    %285 = arith.subf %268, %284 : vector<16x32xf32>
    %cst_125 = arith.constant 9.99999974E-5 : f32
    %286 = vector.broadcast %cst_125 : f32 to vector<16x1xf32>
    %287 = arith.addf %283, %286 : vector<16x1xf32>
    %288 = math.rsqrt %287 : vector<16x1xf32>
    %289 = vector.broadcast %288 : vector<16x1xf32> to vector<16x32xf32>
    %290 = arith.mulf %285, %289 : vector<16x32xf32>
    %291 = vector.broadcast %270 : vector<1x32xf32> to vector<16x32xf32>
    %292 = arith.mulf %290, %291 : vector<16x32xf32>
    %293 = vector.broadcast %272 : vector<1x32xf32> to vector<16x32xf32>
    %294 = arith.addf %292, %293 : vector<16x32xf32>
    %295 = vector.broadcast %7 : vector<16x1xf32> to vector<16x32xf32>
    %296 = arith.mulf %294, %295 : vector<16x32xf32>
    %c1_126 = arith.constant 1 : index
    %c0_127 = arith.constant 0 : index
    %c0_128 = arith.constant 0 : index
    %297 = vector.load %arg10[%c1_126, %c0_127, %c0_128] : memref<2x96x64xbf16, #tpu.memory_space<vmem>>, vector<1x96x64xbf16>
    %298 = vector.shape_cast %297 : vector<1x96x64xbf16> to vector<96x64xbf16>
    %c1_i32_129 = arith.constant 1 : i32
    %299 = tpu.dynamic_rotate %296 by %c1_i32_129 dim 0 : vector<16x32xf32>, i32 -> vector<16x32xf32>
    %300 = vector.broadcast %22 : vector<16x1xf32> to vector<16x32xf32>
    %301 = arith.mulf %299, %300 : vector<16x32xf32>
    %c15_i32_130 = arith.constant 15 : i32
    %302 = tpu.dynamic_rotate %296 by %c15_i32_130 dim 0 : vector<16x32xf32>, i32 -> vector<16x32xf32>
    %303 = vector.broadcast %29 : vector<16x1xf32> to vector<16x32xf32>
    %304 = arith.mulf %302, %303 : vector<16x32xf32>
    %305 = tpu.concatenate %301, %296, %304 in 1 : vector<16x32xf32>, vector<16x32xf32>, vector<16x32xf32> -> vector<16x96xf32>
    %306 = arith.truncf %305 : vector<16x96xf32> to vector<16x96xbf16>
    %cst_131 = arith.constant dense<0.000000e+00> : vector<16x64xf32>
    %307 = tpu.matmul %306, %298, %cst_131 {dimension_numbers = #tpu.dot_dimension_numbers<[1], [0], [0], [1], [0, 0, 1, 1], [], []>} : vector<16x96xbf16>, vector<96x64xbf16>, vector<16x64xf32> -> vector<16x64xf32>
    %c1_132 = arith.constant 1 : index
    %c0_133 = arith.constant 0 : index
    %c0_134 = arith.constant 0 : index
    %308 = vector.load %arg11[%c1_132, %c0_133, %c0_134] : memref<2x1x64xf32, #tpu.memory_space<vmem>>, vector<1x1x64xf32>
    %309 = vector.shape_cast %308 : vector<1x1x64xf32> to vector<1x64xf32>
    %310 = vector.broadcast %309 : vector<1x64xf32> to vector<16x64xf32>
    %311 = arith.addf %307, %310 : vector<16x64xf32>
    %cst_135 = arith.constant 0.000000e+00 : f32
    %312 = vector.broadcast %cst_135 : f32 to vector<16x64xf32>
    %313 = arith.maximumf %311, %312 : vector<16x64xf32>
    %314 = vector.broadcast %7 : vector<16x1xf32> to vector<16x64xf32>
    %315 = arith.mulf %313, %314 : vector<16x64xf32>
    %c1_136 = arith.constant 1 : index
    %c0_137 = arith.constant 0 : index
    %c0_138 = arith.constant 0 : index
    %316 = vector.load %arg12[%c1_136, %c0_137, %c0_138] : memref<2x192x32xbf16, #tpu.memory_space<vmem>>, vector<1x192x32xbf16>
    %317 = vector.shape_cast %316 : vector<1x192x32xbf16> to vector<192x32xbf16>
    %c1_i32_139 = arith.constant 1 : i32
    %318 = tpu.dynamic_rotate %315 by %c1_i32_139 dim 0 : vector<16x64xf32>, i32 -> vector<16x64xf32>
    %319 = vector.broadcast %22 : vector<16x1xf32> to vector<16x64xf32>
    %320 = arith.mulf %318, %319 : vector<16x64xf32>
    %c15_i32_140 = arith.constant 15 : i32
    %321 = tpu.dynamic_rotate %315 by %c15_i32_140 dim 0 : vector<16x64xf32>, i32 -> vector<16x64xf32>
    %322 = vector.broadcast %29 : vector<16x1xf32> to vector<16x64xf32>
    %323 = arith.mulf %321, %322 : vector<16x64xf32>
    %324 = tpu.concatenate %320, %315, %323 in 1 : vector<16x64xf32>, vector<16x64xf32>, vector<16x64xf32> -> vector<16x192xf32>
    %325 = arith.truncf %324 : vector<16x192xf32> to vector<16x192xbf16>
    %cst_141 = arith.constant dense<0.000000e+00> : vector<16x32xf32>
    %326 = tpu.matmul %325, %317, %cst_141 {dimension_numbers = #tpu.dot_dimension_numbers<[1], [0], [0], [1], [0, 0, 1, 1], [], []>} : vector<16x192xbf16>, vector<192x32xbf16>, vector<16x32xf32> -> vector<16x32xf32>
    %c1_142 = arith.constant 1 : index
    %c0_143 = arith.constant 0 : index
    %c0_144 = arith.constant 0 : index
    %327 = vector.load %arg13[%c1_142, %c0_143, %c0_144] : memref<2x1x32xf32, #tpu.memory_space<vmem>>, vector<1x1x32xf32>
    %328 = vector.shape_cast %327 : vector<1x1x32xf32> to vector<1x32xf32>
    %329 = vector.broadcast %328 : vector<1x32xf32> to vector<16x32xf32>
    %330 = arith.addf %326, %329 : vector<16x32xf32>
    %331 = vector.broadcast %7 : vector<16x1xf32> to vector<16x32xf32>
    %332 = arith.mulf %330, %331 : vector<16x32xf32>
    %333 = arith.addf %294, %332 : vector<16x32xf32>
    %c1_145 = arith.constant 1 : index
    %c1_146 = arith.constant 1 : index
    %c0_147 = arith.constant 0 : index
    %c0_148 = arith.constant 0 : index
    %334 = vector.load %arg8[%c1_145, %c1_146, %c0_147, %c0_148] : memref<2x2x1x32xf32, #tpu.memory_space<vmem>>, vector<1x1x1x32xf32>
    %335 = vector.shape_cast %334 : vector<1x1x1x32xf32> to vector<1x32xf32>
    %c1_149 = arith.constant 1 : index
    %c1_150 = arith.constant 1 : index
    %c0_151 = arith.constant 0 : index
    %c0_152 = arith.constant 0 : index
    %336 = vector.load %arg9[%c1_149, %c1_150, %c0_151, %c0_152] : memref<2x2x1x32xf32, #tpu.memory_space<vmem>>, vector<1x1x1x32xf32>
    %337 = vector.shape_cast %336 : vector<1x1x1x32xf32> to vector<1x32xf32>
    %cst_153 = arith.constant dense<0.000000e+00> : vector<16xf32>
    %338 = vector.multi_reduction <add>, %333, %cst_153 [1] : vector<16x32xf32> to vector<16xf32>
    %339 = vector.shape_cast %338 : vector<16xf32> to vector<16x1xf32>
    %cst_154 = arith.constant 3.200000e+01 : f32
    %340 = vector.broadcast %cst_154 : f32 to vector<16x1xf32>
    %341 = arith.divf %339, %340 : vector<16x1xf32>
    %342 = vector.broadcast %341 : vector<16x1xf32> to vector<16x32xf32>
    %343 = arith.subf %333, %342 : vector<16x32xf32>
    %344 = arith.mulf %343, %343 : vector<16x32xf32>
    %cst_155 = arith.constant dense<0.000000e+00> : vector<16xf32>
    %345 = vector.multi_reduction <add>, %344, %cst_155 [1] : vector<16x32xf32> to vector<16xf32>
    %346 = vector.shape_cast %345 : vector<16xf32> to vector<16x1xf32>
    %cst_156 = arith.constant 3.200000e+01 : f32
    %347 = vector.broadcast %cst_156 : f32 to vector<16x1xf32>
    %348 = arith.divf %346, %347 : vector<16x1xf32>
    %349 = vector.broadcast %341 : vector<16x1xf32> to vector<16x32xf32>
    %350 = arith.subf %333, %349 : vector<16x32xf32>
    %cst_157 = arith.constant 9.99999974E-5 : f32
    %351 = vector.broadcast %cst_157 : f32 to vector<16x1xf32>
    %352 = arith.addf %348, %351 : vector<16x1xf32>
    %353 = math.rsqrt %352 : vector<16x1xf32>
    %354 = vector.broadcast %353 : vector<16x1xf32> to vector<16x32xf32>
    %355 = arith.mulf %350, %354 : vector<16x32xf32>
    %356 = vector.broadcast %335 : vector<1x32xf32> to vector<16x32xf32>
    %357 = arith.mulf %355, %356 : vector<16x32xf32>
    %358 = vector.broadcast %337 : vector<1x32xf32> to vector<16x32xf32>
    %359 = arith.addf %357, %358 : vector<16x32xf32>
    %360 = vector.broadcast %7 : vector<16x1xf32> to vector<16x32xf32>
    %361 = arith.mulf %359, %360 : vector<16x32xf32>
    %362 = arith.truncf %361 : vector<16x32xf32> to vector<16x32xbf16>
    %c0_158 = arith.constant 0 : index
    %c0_159 = arith.constant 0 : index
    %363 = vector.load %arg14[%c0_158, %c0_159] : memref<32x32xbf16, #tpu.memory_space<vmem>>, vector<32x32xbf16>
    %cst_160 = arith.constant dense<0.000000e+00> : vector<16x32xf32>
    %364 = tpu.matmul %362, %363, %cst_160 {dimension_numbers = #tpu.dot_dimension_numbers<[1], [0], [0], [1], [0, 0, 1, 1], [], []>} : vector<16x32xbf16>, vector<32x32xbf16>, vector<16x32xf32> -> vector<16x32xf32>
    %c0_161 = arith.constant 0 : index
    %c0_162 = arith.constant 0 : index
    %365 = vector.load %arg15[%c0_161, %c0_162] : memref<1x32xf32, #tpu.memory_space<vmem>>, vector<1x32xf32>
    %366 = vector.broadcast %365 : vector<1x32xf32> to vector<16x32xf32>
    %367 = arith.addf %364, %366 : vector<16x32xf32>
    %368 = vector.broadcast %7 : vector<16x1xf32> to vector<16x32xf32>
    %369 = arith.mulf %367, %368 : vector<16x32xf32>
    %c0_163 = arith.constant 0 : index
    %c0_164 = arith.constant 0 : index
    %c0_165 = arith.constant 0 : index
    %370 = vector.load %arg17[%c0_163, %c0_164, %c0_165] : memref<3x1x64xf32, #tpu.memory_space<vmem>>, vector<3x1x64xf32>
    %c0_166 = arith.constant 0 : index
    %c0_167 = arith.constant 0 : index
    %c0_168 = arith.constant 0 : index
    %371 = vector.load %arg19[%c0_166, %c0_167, %c0_168] : memref<3x1x64xf32, #tpu.memory_space<vmem>>, vector<3x1x64xf32>
    %c0_169 = arith.constant 0 : index
    %c0_170 = arith.constant 0 : index
    %372 = vector.load %arg16[%c0_169, %c0_170] : memref<96x64xbf16, #tpu.memory_space<vmem>>, vector<96x64xbf16>
    %c1_i32_171 = arith.constant 1 : i32
    %373 = tpu.dynamic_rotate %361 by %c1_i32_171 dim 0 : vector<16x32xf32>, i32 -> vector<16x32xf32>
    %374 = vector.broadcast %22 : vector<16x1xf32> to vector<16x32xf32>
    %375 = arith.mulf %373, %374 : vector<16x32xf32>
    %c15_i32_172 = arith.constant 15 : i32
    %376 = tpu.dynamic_rotate %361 by %c15_i32_172 dim 0 : vector<16x32xf32>, i32 -> vector<16x32xf32>
    %377 = vector.broadcast %29 : vector<16x1xf32> to vector<16x32xf32>
    %378 = arith.mulf %376, %377 : vector<16x32xf32>
    %379 = tpu.concatenate %375, %361, %378 in 1 : vector<16x32xf32>, vector<16x32xf32>, vector<16x32xf32> -> vector<16x96xf32>
    %380 = arith.truncf %379 : vector<16x96xf32> to vector<16x96xbf16>
    %cst_173 = arith.constant dense<0.000000e+00> : vector<16x64xf32>
    %381 = tpu.matmul %380, %372, %cst_173 {dimension_numbers = #tpu.dot_dimension_numbers<[1], [0], [0], [1], [0, 0, 1, 1], [], []>} : vector<16x96xbf16>, vector<96x64xbf16>, vector<16x64xf32> -> vector<16x64xf32>
    %382 = vector.extract_strided_slice %370 {offsets = [0, 0, 0], sizes = [1, 1, 64], strides = [1, 1, 1]} : vector<3x1x64xf32> to vector<1x1x64xf32>
    %383 = vector.shape_cast %382 : vector<1x1x64xf32> to vector<1x64xf32>
    %384 = vector.broadcast %383 : vector<1x64xf32> to vector<16x64xf32>
    %385 = arith.addf %381, %384 : vector<16x64xf32>
    %cst_174 = arith.constant 0.000000e+00 : f32
    %386 = vector.broadcast %cst_174 : f32 to vector<16x64xf32>
    %387 = arith.maximumf %385, %386 : vector<16x64xf32>
    %388 = vector.extract_strided_slice %370 {offsets = [1, 0, 0], sizes = [1, 1, 64], strides = [1, 1, 1]} : vector<3x1x64xf32> to vector<1x1x64xf32>
    %389 = vector.shape_cast %388 : vector<1x1x64xf32> to vector<1x64xf32>
    %390 = vector.extract_strided_slice %370 {offsets = [2, 0, 0], sizes = [1, 1, 64], strides = [1, 1, 1]} : vector<3x1x64xf32> to vector<1x1x64xf32>
    %391 = vector.shape_cast %390 : vector<1x1x64xf32> to vector<1x64xf32>
    %cst_175 = arith.constant dense<0.000000e+00> : vector<16xf32>
    %392 = vector.multi_reduction <add>, %387, %cst_175 [1] : vector<16x64xf32> to vector<16xf32>
    %393 = vector.shape_cast %392 : vector<16xf32> to vector<16x1xf32>
    %cst_176 = arith.constant 6.400000e+01 : f32
    %394 = vector.broadcast %cst_176 : f32 to vector<16x1xf32>
    %395 = arith.divf %393, %394 : vector<16x1xf32>
    %396 = vector.broadcast %395 : vector<16x1xf32> to vector<16x64xf32>
    %397 = arith.subf %387, %396 : vector<16x64xf32>
    %398 = arith.mulf %397, %397 : vector<16x64xf32>
    %cst_177 = arith.constant dense<0.000000e+00> : vector<16xf32>
    %399 = vector.multi_reduction <add>, %398, %cst_177 [1] : vector<16x64xf32> to vector<16xf32>
    %400 = vector.shape_cast %399 : vector<16xf32> to vector<16x1xf32>
    %cst_178 = arith.constant 6.400000e+01 : f32
    %401 = vector.broadcast %cst_178 : f32 to vector<16x1xf32>
    %402 = arith.divf %400, %401 : vector<16x1xf32>
    %403 = vector.broadcast %395 : vector<16x1xf32> to vector<16x64xf32>
    %404 = arith.subf %387, %403 : vector<16x64xf32>
    %cst_179 = arith.constant 9.99999974E-5 : f32
    %405 = vector.broadcast %cst_179 : f32 to vector<16x1xf32>
    %406 = arith.addf %402, %405 : vector<16x1xf32>
    %407 = math.rsqrt %406 : vector<16x1xf32>
    %408 = vector.broadcast %407 : vector<16x1xf32> to vector<16x64xf32>
    %409 = arith.mulf %404, %408 : vector<16x64xf32>
    %410 = vector.broadcast %389 : vector<1x64xf32> to vector<16x64xf32>
    %411 = arith.mulf %409, %410 : vector<16x64xf32>
    %412 = vector.broadcast %391 : vector<1x64xf32> to vector<16x64xf32>
    %413 = arith.addf %411, %412 : vector<16x64xf32>
    %414 = vector.broadcast %7 : vector<16x1xf32> to vector<16x64xf32>
    %415 = arith.mulf %413, %414 : vector<16x64xf32>
    %c0_180 = arith.constant 0 : index
    %c0_181 = arith.constant 0 : index
    %416 = vector.load %arg18[%c0_180, %c0_181] : memref<192x64xbf16, #tpu.memory_space<vmem>>, vector<192x64xbf16>
    %c1_i32_182 = arith.constant 1 : i32
    %417 = tpu.dynamic_rotate %415 by %c1_i32_182 dim 0 : vector<16x64xf32>, i32 -> vector<16x64xf32>
    %418 = vector.broadcast %22 : vector<16x1xf32> to vector<16x64xf32>
    %419 = arith.mulf %417, %418 : vector<16x64xf32>
    %c15_i32_183 = arith.constant 15 : i32
    %420 = tpu.dynamic_rotate %415 by %c15_i32_183 dim 0 : vector<16x64xf32>, i32 -> vector<16x64xf32>
    %421 = vector.broadcast %29 : vector<16x1xf32> to vector<16x64xf32>
    %422 = arith.mulf %420, %421 : vector<16x64xf32>
    %423 = tpu.concatenate %419, %415, %422 in 1 : vector<16x64xf32>, vector<16x64xf32>, vector<16x64xf32> -> vector<16x192xf32>
    %424 = arith.truncf %423 : vector<16x192xf32> to vector<16x192xbf16>
    %cst_184 = arith.constant dense<0.000000e+00> : vector<16x64xf32>
    %425 = tpu.matmul %424, %416, %cst_184 {dimension_numbers = #tpu.dot_dimension_numbers<[1], [0], [0], [1], [0, 0, 1, 1], [], []>} : vector<16x192xbf16>, vector<192x64xbf16>, vector<16x64xf32> -> vector<16x64xf32>
    %426 = vector.extract_strided_slice %371 {offsets = [0, 0, 0], sizes = [1, 1, 64], strides = [1, 1, 1]} : vector<3x1x64xf32> to vector<1x1x64xf32>
    %427 = vector.shape_cast %426 : vector<1x1x64xf32> to vector<1x64xf32>
    %428 = vector.broadcast %427 : vector<1x64xf32> to vector<16x64xf32>
    %429 = arith.addf %425, %428 : vector<16x64xf32>
    %cst_185 = arith.constant 0.000000e+00 : f32
    %430 = vector.broadcast %cst_185 : f32 to vector<16x64xf32>
    %431 = arith.maximumf %429, %430 : vector<16x64xf32>
    %432 = vector.extract_strided_slice %371 {offsets = [1, 0, 0], sizes = [1, 1, 64], strides = [1, 1, 1]} : vector<3x1x64xf32> to vector<1x1x64xf32>
    %433 = vector.shape_cast %432 : vector<1x1x64xf32> to vector<1x64xf32>
    %434 = vector.extract_strided_slice %371 {offsets = [2, 0, 0], sizes = [1, 1, 64], strides = [1, 1, 1]} : vector<3x1x64xf32> to vector<1x1x64xf32>
    %435 = vector.shape_cast %434 : vector<1x1x64xf32> to vector<1x64xf32>
    %cst_186 = arith.constant dense<0.000000e+00> : vector<16xf32>
    %436 = vector.multi_reduction <add>, %431, %cst_186 [1] : vector<16x64xf32> to vector<16xf32>
    %437 = vector.shape_cast %436 : vector<16xf32> to vector<16x1xf32>
    %cst_187 = arith.constant 6.400000e+01 : f32
    %438 = vector.broadcast %cst_187 : f32 to vector<16x1xf32>
    %439 = arith.divf %437, %438 : vector<16x1xf32>
    %440 = vector.broadcast %439 : vector<16x1xf32> to vector<16x64xf32>
    %441 = arith.subf %431, %440 : vector<16x64xf32>
    %442 = arith.mulf %441, %441 : vector<16x64xf32>
    %cst_188 = arith.constant dense<0.000000e+00> : vector<16xf32>
    %443 = vector.multi_reduction <add>, %442, %cst_188 [1] : vector<16x64xf32> to vector<16xf32>
    %444 = vector.shape_cast %443 : vector<16xf32> to vector<16x1xf32>
    %cst_189 = arith.constant 6.400000e+01 : f32
    %445 = vector.broadcast %cst_189 : f32 to vector<16x1xf32>
    %446 = arith.divf %444, %445 : vector<16x1xf32>
    %447 = vector.broadcast %439 : vector<16x1xf32> to vector<16x64xf32>
    %448 = arith.subf %431, %447 : vector<16x64xf32>
    %cst_190 = arith.constant 9.99999974E-5 : f32
    %449 = vector.broadcast %cst_190 : f32 to vector<16x1xf32>
    %450 = arith.addf %446, %449 : vector<16x1xf32>
    %451 = math.rsqrt %450 : vector<16x1xf32>
    %452 = vector.broadcast %451 : vector<16x1xf32> to vector<16x64xf32>
    %453 = arith.mulf %448, %452 : vector<16x64xf32>
    %454 = vector.broadcast %433 : vector<1x64xf32> to vector<16x64xf32>
    %455 = arith.mulf %453, %454 : vector<16x64xf32>
    %456 = vector.broadcast %435 : vector<1x64xf32> to vector<16x64xf32>
    %457 = arith.addf %455, %456 : vector<16x64xf32>
    %458 = vector.broadcast %7 : vector<16x1xf32> to vector<16x64xf32>
    %459 = arith.mulf %457, %458 : vector<16x64xf32>
    %460 = arith.truncf %459 : vector<16x64xf32> to vector<16x64xbf16>
    %c0_191 = arith.constant 0 : index
    %c0_192 = arith.constant 0 : index
    %461 = vector.load %arg20[%c0_191, %c0_192] : memref<64x1xbf16, #tpu.memory_space<vmem>>, vector<64x1xbf16>
    %cst_193 = arith.constant dense<0.000000e+00> : vector<16x1xf32>
    %462 = tpu.matmul %460, %461, %cst_193 {dimension_numbers = #tpu.dot_dimension_numbers<[1], [0], [0], [1], [0, 0, 1, 1], [], []>} : vector<16x64xbf16>, vector<64x1xbf16>, vector<16x1xf32> -> vector<16x1xf32>
    %c0_194 = arith.constant 0 : index
    %c0_195 = arith.constant 0 : index
    %463 = vector.load %arg21[%c0_194, %c0_195] : memref<1x1xf32, #tpu.memory_space<vmem>>, vector<1x1xf32>
    %464 = vector.broadcast %463 : vector<1x1xf32> to vector<16x1xf32>
    %465 = arith.addf %462, %464 : vector<16x1xf32>
    %cst_196 = arith.constant 0.000000e+00 : f32
    %466 = vector.broadcast %cst_196 : f32 to vector<16x95xf32>
    %467 = tpu.concatenate %369, %465, %466 in 1 : vector<16x32xf32>, vector<16x1xf32>, vector<16x95xf32> -> vector<16x128xf32>
    %c0_197 = arith.constant 0 : index
    %c0_198 = arith.constant 0 : index
    %c0_199 = arith.constant 0 : index
    %468 = vector.load %arg22[%c0_197, %c0_198, %c0_199] : memref<1x16x128xf32, #tpu.memory_space<vmem>>, vector<1x16x128xf32>
    %469 = vector.shape_cast %468 : vector<1x16x128xf32> to vector<16x128xf32>
    %470 = vector.shape_cast %467 : vector<16x128xf32> to vector<1x16x128xf32>
    tpu.vector_store %arg22[%c0_197, %c0_198, %c0_199], %470 {strides = array<i32>} : memref<1x16x128xf32, #tpu.memory_space<vmem>>, vector<1x16x128xf32>,
    return
  }
  func.func @transform_0(%arg0: i32) -> i32 {
    %c0_i32 = arith.constant 0 : i32
    %c0_i32_0 = arith.constant 0 : i32
    return %c0_i32 : i32
  }
  func.func @transform_1(%arg0: i32) -> (i32, i32, i32) {
    %c0_i32 = arith.constant 0 : i32
    %c0_i32_0 = arith.constant 0 : i32
    %c0_i32_1 = arith.constant 0 : i32
    return %arg0, %c0_i32, %c0_i32_0 : i32, i32, i32
  }
  func.func @transform_2(%arg0: i32) -> (i32, i32) {
    %c0_i32 = arith.constant 0 : i32
    %c0_i32_0 = arith.constant 0 : i32
    %c0_i32_1 = arith.constant 0 : i32
    return %c0_i32, %c0_i32_0 : i32, i32
  }
  func.func @transform_3(%arg0: i32) -> (i32, i32, i32) {
    %c0_i32 = arith.constant 0 : i32
    %c0_i32_0 = arith.constant 0 : i32
    %c0_i32_1 = arith.constant 0 : i32
    %c0_i32_2 = arith.constant 0 : i32
    return %c0_i32, %c0_i32_0, %c0_i32_1 : i32, i32, i32
  }
  func.func @transform_4(%arg0: i32) -> (i32, i32, i32) {
    %c0_i32 = arith.constant 0 : i32
    %c0_i32_0 = arith.constant 0 : i32
    %c0_i32_1 = arith.constant 0 : i32
    %c0_i32_2 = arith.constant 0 : i32
    return %c0_i32, %c0_i32_0, %c0_i32_1 : i32, i32, i32
  }
  func.func @transform_5(%arg0: i32) -> (i32, i32, i32, i32) {
    %c0_i32 = arith.constant 0 : i32
    %c0_i32_0 = arith.constant 0 : i32
    %c0_i32_1 = arith.constant 0 : i32
    %c0_i32_2 = arith.constant 0 : i32
    %c0_i32_3 = arith.constant 0 : i32
    return %c0_i32, %c0_i32_0, %c0_i32_1, %c0_i32_2 : i32, i32, i32, i32
  }
  func.func @transform_6(%arg0: i32) -> (i32, i32, i32) {
    %c0_i32 = arith.constant 0 : i32
    %c0_i32_0 = arith.constant 0 : i32
    %c0_i32_1 = arith.constant 0 : i32
    %c0_i32_2 = arith.constant 0 : i32
    return %c0_i32, %c0_i32_0, %c0_i32_1 : i32, i32, i32
  }
  func.func @transform_7(%arg0: i32) -> (i32, i32, i32, i32) {
    %c0_i32 = arith.constant 0 : i32
    %c0_i32_0 = arith.constant 0 : i32
    %c0_i32_1 = arith.constant 0 : i32
    %c0_i32_2 = arith.constant 0 : i32
    %c0_i32_3 = arith.constant 0 : i32
    return %c0_i32, %c0_i32_0, %c0_i32_1, %c0_i32_2 : i32, i32, i32, i32
  }
  func.func @transform_8(%arg0: i32) -> (i32, i32, i32, i32) {
    %c0_i32 = arith.constant 0 : i32
    %c0_i32_0 = arith.constant 0 : i32
    %c0_i32_1 = arith.constant 0 : i32
    %c0_i32_2 = arith.constant 0 : i32
    %c0_i32_3 = arith.constant 0 : i32
    return %c0_i32, %c0_i32_0, %c0_i32_1, %c0_i32_2 : i32, i32, i32, i32
  }
  func.func @transform_9(%arg0: i32) -> (i32, i32, i32) {
    %c0_i32 = arith.constant 0 : i32
    %c0_i32_0 = arith.constant 0 : i32
    %c0_i32_1 = arith.constant 0 : i32
    %c0_i32_2 = arith.constant 0 : i32
    return %c0_i32, %c0_i32_0, %c0_i32_1 : i32, i32, i32
  }
  func.func @transform_10(%arg0: i32) -> (i32, i32, i32) {
    %c0_i32 = arith.constant 0 : i32
    %c0_i32_0 = arith.constant 0 : i32
    %c0_i32_1 = arith.constant 0 : i32
    %c0_i32_2 = arith.constant 0 : i32
    return %c0_i32, %c0_i32_0, %c0_i32_1 : i32, i32, i32
  }
  func.func @transform_11(%arg0: i32) -> (i32, i32, i32) {
    %c0_i32 = arith.constant 0 : i32
    %c0_i32_0 = arith.constant 0 : i32
    %c0_i32_1 = arith.constant 0 : i32
    %c0_i32_2 = arith.constant 0 : i32
    return %c0_i32, %c0_i32_0, %c0_i32_1 : i32, i32, i32
  }
  func.func @transform_12(%arg0: i32) -> (i32, i32, i32) {
    %c0_i32 = arith.constant 0 : i32
    %c0_i32_0 = arith.constant 0 : i32
    %c0_i32_1 = arith.constant 0 : i32
    %c0_i32_2 = arith.constant 0 : i32
    return %c0_i32, %c0_i32_0, %c0_i32_1 : i32, i32, i32
  }
  func.func @transform_13(%arg0: i32) -> (i32, i32) {
    %c0_i32 = arith.constant 0 : i32
    %c0_i32_0 = arith.constant 0 : i32
    %c0_i32_1 = arith.constant 0 : i32
    return %c0_i32, %c0_i32_0 : i32, i32
  }
  func.func @transform_14(%arg0: i32) -> (i32, i32) {
    %c0_i32 = arith.constant 0 : i32
    %c0_i32_0 = arith.constant 0 : i32
    %c0_i32_1 = arith.constant 0 : i32
    return %c0_i32, %c0_i32_0 : i32, i32
  }
  func.func @transform_15(%arg0: i32) -> (i32, i32) {
    %c0_i32 = arith.constant 0 : i32
    %c0_i32_0 = arith.constant 0 : i32
    %c0_i32_1 = arith.constant 0 : i32
    return %c0_i32, %c0_i32_0 : i32, i32
  }
  func.func @transform_16(%arg0: i32) -> (i32, i32, i32) {
    %c0_i32 = arith.constant 0 : i32
    %c0_i32_0 = arith.constant 0 : i32
    %c0_i32_1 = arith.constant 0 : i32
    %c0_i32_2 = arith.constant 0 : i32
    return %c0_i32, %c0_i32_0, %c0_i32_1 : i32, i32, i32
  }
  func.func @transform_17(%arg0: i32) -> (i32, i32) {
    %c0_i32 = arith.constant 0 : i32
    %c0_i32_0 = arith.constant 0 : i32
    %c0_i32_1 = arith.constant 0 : i32
    return %c0_i32, %c0_i32_0 : i32, i32
  }
  func.func @transform_18(%arg0: i32) -> (i32, i32, i32) {
    %c0_i32 = arith.constant 0 : i32
    %c0_i32_0 = arith.constant 0 : i32
    %c0_i32_1 = arith.constant 0 : i32
    %c0_i32_2 = arith.constant 0 : i32
    return %c0_i32, %c0_i32_0, %c0_i32_1 : i32, i32, i32
  }
  func.func @transform_19(%arg0: i32) -> (i32, i32) {
    %c0_i32 = arith.constant 0 : i32
    %c0_i32_0 = arith.constant 0 : i32
    %c0_i32_1 = arith.constant 0 : i32
    return %c0_i32, %c0_i32_0 : i32, i32
  }
  func.func @transform_20(%arg0: i32) -> (i32, i32) {
    %c0_i32 = arith.constant 0 : i32
    %c0_i32_0 = arith.constant 0 : i32
    %c0_i32_1 = arith.constant 0 : i32
    return %c0_i32, %c0_i32_0 : i32, i32
  }
  func.func @transform_21(%arg0: i32) -> (i32, i32, i32) {
    %c0_i32 = arith.constant 0 : i32
    %c0_i32_0 = arith.constant 0 : i32
    %c0_i32_1 = arith.constant 0 : i32
    return %arg0, %c0_i32, %c0_i32_0 : i32, i32, i32
  }
}

</mosaic_0001>

<bundles_post_ra>
// kernel: _lambda_.1
= control target key start
LH: loop header
LB: loop body
LE: loop exit
PB: predicated region body
PF: predicated region fallthrough
CT: control target
= control target key end

     0   :  { %s4660_s0 = inlined_call_operand.vmem [shape: s32[2], index: 0, kind: input, shape index: {}]   ;;  %s4661_s1 = inlined_call_operand.vmem [shape: s32[2,16,1], index: 1, kind: input, shape index: {}]   ;;  %s4662_s2 = inlined_call_operand.vmem [shape: bf16[40,32], index: 2, kind: input, shape index: {}]   ;;  %s4663_s3 = inlined_call_operand.vmem [shape: bf16[2,32,96], index: 3, kind: input, shape index: {}]   ;;  %s4664_s4 = inlined_call_operand.vmem [shape: f32[2,1,96], index: 4, kind: input, shape index: {}]   ;;  %s4665_s5 = inlined_call_operand.vmem [shape: bf16[2,2,16,32], index: 5, kind: input, shape index: {}]   ;;  %s4666_s6 = inlined_call_operand.vmem [shape: f32[2,1,32], index: 6, kind: input, shape index: {}]   ;;  %s4667_s7 = inlined_call_operand.vmem [shape: f32[2,2,1,32], index: 7, kind: input, shape index: {}]   ;;  %s4668_s8 = inlined_call_operand.vmem [shape: f32[2,2,1,32], index: 8, kind: input, shape index: {}]   ;;  %s4669_s9 = inlined_call_operand.vmem [shape: bf16[2,96,64], index: 9, kind: input, shape index: {}]   ;;  %s4670_s10 = inlined_call_operand.vmem [shape: f32[2,1,64], index: 10, kind: input, shape index: {}]   ;;  %s4671_s11 = inlined_call_operand.vmem [shape: bf16[2,192,32], index: 11, kind: input, shape index: {}]   ;;  %s4672_s12 = inlined_call_operand.vmem [shape: f32[2,1,32], index: 12, kind: input, shape index: {}]   ;;  %s4673_s13 = inlined_call_operand.vmem [shape: bf16[32,32], index: 13, kind: input, shape index: {}]   ;;  %s4674_s14 = inlined_call_operand.vmem [shape: f32[1,32], index: 14, kind: input, shape index: {}]   ;;  %s4675_s15 = inlined_call_operand.vmem [shape: bf16[96,64], index: 15, kind: input, shape index: {}]   ;;  %s4676_s16 = inlined_call_operand.vmem [shape: f32[3,1,64], index: 16, kind: input, shape index: {}]   ;;  %s4677_s17 = inlined_call_operand.vmem [shape: bf16[192,64], index: 17, kind: input, shape index: {}]   ;;  %s4678_s18 = inlined_call_operand.vmem [shape: f32[3,1,64], index: 18, kind: input, shape index: {}]   ;;  %s4679_s19 = inlined_call_operand.vmem [shape: bf16[64,1], index: 19, kind: input, shape index: {}]   ;;  %s4680_s20 = inlined_call_operand.<no memory space> [shape: f32[1,1], index: 20, kind: input, shape index: {}]   ;;  %s4681_s21 = inlined_call_operand.vmem [shape: f32[2,16,128], index: 21, kind: output, shape index: {}]  }
   0x1   :  { %4692 = sst [smem:[#allocation6_spill]] %s4660_s0  ;;  %v26_v0 = vstv %s4680_s20 }
   0x2   :  { %4693 = sst [smem:[#allocation7_spill]] %s4661_s1  ;;  %27 = vst [vmem:[#allocation2] sm:$0x1] %v26_v0 }
   0x3   :  { %4694 = sst [smem:[#allocation8_spill]] %s4662_s2 }
   0x4   :  { %4695 = sst [smem:[#allocation9_spill]] %s4663_s3 }
   0x5   :  { %4696 = sst [smem:[#allocation10_spill]] %s4664_s4 }
   0x6   :  { %4697 = sst [smem:[#allocation11_spill]] %s4665_s5 }
   0x7   :  { %28 = vsyncpa [#allocation4], 0  ;;  %s3916_s26 = smov 0  }
   0x8 LB: > { %s3922_s27 = sadd.s32 4294967295, %s3790_s26   ;;  %p3141_p0 = scmp.ge.s32.totalorder %s3790_s26, 1  ;;  %s3790_s26 = sphi %s3916_s26, %s34_s26  }
   0x9   : > { %p511_p1 = scmp.lt.s32.totalorder %s3790_s26, 3  ;;  %s4698_s28 = sld [smem:[#allocation6_spill]] }
   0xa   : > { %p3571_p3 = scmp.eq.s32.totalorder %s3922_s27, 0 }
   0xb   : > { %p3929_p2 = pnand %p3141_p0, %p511_p1 }
   0xd   : > { %p3567_p4 = pneg %p3929_p2 }
   0xf   : > { %s524_s29 = sshll.u32 %s4698_s28, 4  ;;  %p3568_p5 = pnand %p3571_p3, %p3567_p4  ;;  %s525_s29 = int_to_ptr.vmem [resolvable:$true] %s524_s29 }
  0x10   : > { %s3765_s4 = scalar_lea.vmem %s525_s29, 16  ;;  %p3773_p10 = scmp.lt.s32.totalorder %s525_s29, %s525_s29 }
  0x11   : > { %p3766_p6 = scmp.ne.s32.totalorder %s525_s29, %s3765_s4  ;;  %p3767_p7 = pneg %p3568_p5 }
  0x12   : > { %p3774_p11 = scmp.lt.s32.totalorder %s3765_s4, %s3765_s4 }
  0x13   : > { %p3768_p8 = pnand %p3767_p7, %p3766_p6 }
  0x14   : > { %p3775_p12 = por %p3774_p11, %p3773_p10 }
  0x15   : > { %p3769_p9 = pneg %p3768_p8 }
  0x17   : > { %p3776_p13 = pnand %p3775_p12, %p3769_p9 }
  0x19   : > { %3779 = shalt.err (!%p3776_p13)
}
  0x1a   : > { %s3792_s30 = smov [#allocation3]   ;;  %602 = sbr.rel (%p3929_p2) target bundleno = 7533 (0x1d6d), region = 104 }
  0x1b   : > { %3570 = dma.vmem_to_smem (!%p3568_p5), %s525_s29, 16, %s3792_s30, [#allocation4]  }
  0x1f   : > { %3785 = dma.done.wait (%p3571_p3), [#allocation4], 16  }
  0x20   : > { %3787 = vsyncadd (%p3571_p3), [#allocation4], 4294967280 }
  0x21   : > { %608 = sfence }
  0x22   : > { %p663_p0 = scmp.lt.s32.totalorder %s3922_s27, 1  ;;  %vm755_vm0 = vcmask 1043456   ;;  %v3793_v1 = vmov 0   ;;  %v3794_v2 = vmov 0.0   ;;  %s4700_s23 = sld [smem:[#allocation8_spill]]  ;;  %vm3795_vm1 = vmmov 0  }
  0x23   : > { %3592 = vset.pattern.permute.xlu0 %v3793_v1  ;;  %3397 = vmatprep.subr.bf16.mxu1 %v3794_v2  ;;  %s4701_s28 = sld [smem:[#allocation7_spill]]  ;;  %v675_v9 = vlaneseq  ;;  %vm751_vm4 = vcmask 326656   ;;  %vm828_vm7 = vcmask 261120   ;;  %s3797_s0 = smov 96   ;;  %vm877_vm8 = vcmask 130048  }
  0x24   : > { %s3951_s1 = scalar_select %p663_p0, %s3922_s27, 1  ;;  %3421 = vmatprep.subr.bf16.mxu0 %v3794_v2  ;;  %3403 = vmatprep.mubr.msk.bf16.mxu1 %vm3795_vm1, %v3794_v2  ;;  %v3799_v46 = vmov -10000.0  }
  0x25   : > { %3423 = vmatprep.mubr.msk.bf16.mxu0 %vm3795_vm1, %v3794_v2  ;;  %v3973_v10 = vand.u32 127, %v675_v9  ;;  %s4702_s22 = sld [smem:[#allocation9_spill]]  ;;  %v3990_v18 = vshrl.u32 %v675_v9, 7  ;;  %s4688_s4 = smov 80  }
  0x26   : > { %s4686_s24 = sshll.u32 %s3951_s1, 4  ;;  %s674_s3 = sld [smem:[#allocation3 + %s3922_s27]] }
  0x27   : > { %v3993_v19 = vadd.s32 8, %v3990_v18  ;;  %s4687_s30 = smov 48   ;;  %s3801_s5 = smov 64   ;;  %vm1303_vm13 = vcmp.lt.s32.totalorder %v3990_v18, 1  ;;  %vm1310_vm14 = vcmp.lt.s32.totalorder %v3990_v18, 7  ;;  %vm696_vm15 = vcmp.ge.s32.totalorder %v3990_v18, 1 }
  0x28   : > { %v3638_v3 = vld [vmem:[%s4700_s23 + $0x10] ss:$0 sps:$4 sm:$0xff]   ;;  %v3639_v5 = vld [vmem:[%s4700_s23 + $0x8] sm:$0xff]   ;;  %v3640_v8 = vld [vmem:[%s4700_s23] sm:$0xff]   ;;  %s4705_s2 = smov 112   ;;  %s4707_s25 = smov 48  }
  0x29   : > { %v757_v4 = vsel %vm755_vm0, %v3638_v3, 0  ;;  %s667_s29 = scalar_lea.vmem %s4701_s28, %s4686_s24  ;;  %s4703_s28 = sld [smem:[#allocation10_spill]]  ;;  %vm709_vm12 = vcmp.lt.s32.totalorder %v3993_v19, 15  ;;  %vm1333_vm0 = vcmask 523264  }
  0x2a   : > { %3398 = vmatpush3.bf16.msra.mxu1 %v757_v4  ;;  %v716_v6 = vld [vmem:[%s667_s29] sm:$0xff]  ;;  %v717_v7 = vld [vmem:[%s667_s29 + $0x8] sm:$0xff]  ;;  %s4689_s29 = smov 112   ;;  %s4690_s24 = smov 32  }
  0x2b   : > { %3399 = vmatprep.subr.bf16.mxu1 %v3794_v2  ;;  %719 = vperm.xlu0 %3592, %v716_v6   ;;  %v3641_v16 = vld [vmem:[%s4702_s22 + $0x8] sm:$0xff]   ;;  %v3642_v17 = vld [vmem:[%s4702_s22] sm:$0xff]   ;;  %s4708_s20 = smov 32  }
  0x2c   : > { %v680_v20 = vstv %s674_s3  ;;  %s4704_s3 = sld [smem:[#allocation11_spill]] }
  0x2d   : > { %vm681_vm5 = vcmp.lt.s32.totalorder %v3990_v18, %v680_v20  ;;  %vm682_vm6 = vcmp.lt.s32.totalorder %v3993_v19, %v680_v20  ;;  %vm687_vm9 = vcmp.lt.s32.totalorder %v3973_v10, %v680_v20 }
  0x2e   : > { %3400 = vmatpush3.bf16.msra.mxu1 %v3639_v5  ;;  %v4000_v24 = vsel %vm681_vm5, 1.0, %v3794_v2  ;;  %v4005_v25 = vsel %vm682_vm6, 1.0, %v3794_v2  ;;  %vm692_vm10 = vmand %vm681_vm5, %vm687_vm9 }
  0x2f   : > { %3401 = vmatprep.subr.bf16.mxu1 %v3794_v2  ;;  %722 = vperm.xlu0 %3592, %v717_v7   ;;  %v3160_v33 = vld [vmem:[%s4703_s28] ss:$0 sm:$0xff]  ;;  %v4043_v47 = vsel %vm692_vm10, 0.0, %v3799_v46  ;;  %vm693_vm11 = vmand %vm682_vm6, %vm687_vm9 }
  0x30   : > { %v4048_v52 = vsel %vm693_vm11, 0.0, %v3799_v46 }
  0x32   : > { %3402 = vmatpush3.bf16.msra.mxu1 %v3640_v8 }
  0x33   : > { %3407 = vmatprep.subr.bf16.mxu1 %v3794_v2 }
  0xa6   : > { %v720_v11 = vpop.permute.xlu0 %719 }
  0xa7   : > { %vm724_vm2 = vcmp.eq.s32.totalorder %v720_v11, %v3973_v10 }
  0xa8   : > { %v3154_v13 = vsel %vm724_vm2, 1.0, %v3794_v2  ;;  %vm1380_vm2 = vcmask 785408  }
  0xaa   : > { %v723_v12 = vpop.permute.xlu0 %722 }
  0xab   : > { %vm725_vm3 = vcmp.eq.s32.totalorder %v723_v12, %v3973_v10 }
  0xac   : > { %v3155_v14 = vsel %vm725_vm3, 1.0, %v3794_v2 }
  0xad   : > { %v730_v15 = vpack.c.bf16 %v3155_v14, %v3154_v13 }
  0xaf   : > { %3404 = vmatmul.mubr.msk.bf16.vlgmr.msra.gmra.mxu1 %vm751_vm4, %v730_v15 }
  0xb0   : > { %3411 = vmatprep.mubr.msk.bf16.mxu1 %vm3795_vm1, %v3794_v2  ;;  %3408 = vmatpush3.bf16.msra.mxu1 %v3641_v16 }
  0xb1   : > { %3409 = vmatprep.subr.bf16.mxu1 %v3794_v2 }
  0xb4   : > { %3410 = vmatpush3.bf16.msra.mxu1 %v3642_v17 }
  0xb5   : > { %3415 = vmatprep.subr.bf16.mxu1 %v3794_v2 }
 0x16f   : > { %v793_v21 = vpop.f32.mrf.mxu1 }
 0x170   : > { %v800_v23 = vmul.f32 5.656854, %v793_v21 }
 0x171   : > { %v3405_v22 = vpop.f32.mrf.mxu1 }
 0x172   : > { %v4008_v29 = vmul.f32 %v4000_v24, %v800_v23 }
 0x173   : > { %v796_v26 = vpop.f32.mrf.mxu1 }
 0x174   : > { %v801_v27 = vmul.f32 5.656854, %v796_v26 }
 0x175   : > { %v3406_v28 = vpop.f32.mrf.mxu1 }
 0x176   : > { %v4011_v30 = vmul.f32 %v4005_v25, %v801_v27 }
 0x178   : > { %v804_v31 = vpack.c.bf16 %v4011_v30, %v4008_v29 }
 0x17a   : > { %3412 = vmatmul.mubr.msk.bf16.vlgmr.msra.gmra.mxu1 %vm828_vm7, %v804_v31 }
 0x17b   : > { %3417 = vmatprep.mubr.msk.bf16.mxu1 %vm3795_vm1, %v3794_v2 }
 0x23a   : > { %v866_v32 = vpop.f32.mrf.mxu1 }
 0x23b   : > { %v867_v36 = vadd.f32 %v3160_v33, %v866_v32 }
 0x23c   : > { %v3413_v34 = vpop.f32.mrf.mxu1 }
 0x23e   : > { %v869_v35 = vpop.f32.mrf.mxu1 }
 0x23f   : > { %v870_v37 = vadd.f32 %v3160_v33, %v869_v35 }
 0x240   : > { %v3414_v38 = vpop.f32.mrf.mxu1 }
 0x241   : > { %v4021_v39 = vpack.c.bf16 %v870_v37, %v867_v36 }
 0x243   : > { %1002 = vrot.lane.b32.xlu0 %v4021_v39, %s4689_s29  ;;  %875 = vrot.lane.b32.xlu1 %v4021_v39, %s3797_s0 }
 0x247   : > { %1004 = vrot.lane.b32.xlu1 %v4021_v39, %s4688_s4 }
 0x2b5   : > { %v876_v40 = vpop.permute.xlu1 %875  ;;  %v1003_v44 = vpop.permute.xlu0 %1002 }
 0x2b6   : > { %v882_v41 = vsel %vm877_vm8, %v876_v40, 0 }
 0x2b7   : > { %3416 = vmatpush3.bf16.xpose.msra.mxu1 %v882_v41 }
 0x2b8   : > { %3427 = vmatprep.subr.bf16.mxu1 %v3794_v2 }
 0x2b9   : > { %v1005_v42 = vpop.permute.xlu1 %1004 }
 0x2ba   : > { %v1010_v43 = vsel %vm877_vm8, %v1005_v42, 0 }
 0x2be   : > { %3418 = vmatmul.mubr.msk.bf16.vlgmr.msra.gmra.mxu1 %vm877_vm8, %v4021_v39 }
 0x2bf   : > { %3428 = vmatpush3.bf16.xpose.msra.mxu1 %v1010_v43  ;;  %3429 = vmatprep.mubr.msk.bf16.mxu1 %vm3795_vm1, %v3794_v2 }
 0x2c0   : > { %3439 = vmatprep.subr.bf16.mxu1 %v3794_v2 }
 0x2c6   : > { %3430 = vmatmul.mubr.msk.bf16.vlgmr.msra.gmra.mxu1 %vm877_vm8, %v1003_v44 }
 0x2c7   : > { %3441 = vmatprep.mubr.msk.bf16.mxu1 %vm3795_vm1, %v3794_v2 }
 0x37e   : > { %v918_v45 = vpop.f32.mrf.mxu1 }
 0x37f   : > { %v925_v48 = vmul.f32 0.25, %v918_v45 }
 0x380   : > { %v3419_v49 = vpop.f32.mrf.mxu1 }
 0x381   : > { %v927_v50 = vadd.f32 %v925_v48, %v4043_v47  ;;  %v3643_v49 = vld [vmem:[%s4704_s3] sm:$0xff]  }
 0x382   : > { %v921_v51 = vpop.f32.mrf.mxu1 }
 0x383   : > { %v926_v53 = vmul.f32 0.25, %v921_v51  ;;  %v929_v54 = vsel %vm877_vm8, %v927_v50, -inf }
 0x384   : > { %930 = vmax.xlane.f32.xlu1 %v929_v54  ;;  %v3420_v55 = vpop.f32.mrf.mxu1 }
 0x385   : > { %v928_v56 = vadd.f32 %v926_v53, %v4048_v52 }
 0x386   : > { %v1046_v57 = vpop.f32.mrf.mxu1 }
 0x387   : > { %v1053_v58 = vmul.f32 0.25, %v1046_v57  ;;  %v932_v59 = vsel %vm877_vm8, %v928_v56, -inf }
 0x388   : > { %933 = vmax.xlane.f32.xlu0 %v932_v59  ;;  %v3431_v60 = vpop.f32.mrf.mxu1 }
 0x389   : > { %v1055_v61 = vadd.f32 %v1053_v58, %v4043_v47 }
 0x38a   : > { %v1049_v62 = vpop.f32.mrf.mxu1 }
 0x38b   : > { %v1054_v63 = vmul.f32 0.25, %v1049_v62  ;;  %v1057_v0 = vsel %vm877_vm8, %v1055_v61, -inf }
 0x38c   : > { %1058 = vmax.xlane.f32.xlu0 %v1057_v0  ;;  %v3432_v3 = vpop.f32.mrf.mxu1 }
 0x38d   : > { %v1056_v4 = vadd.f32 %v1054_v63, %v4048_v52 }
 0x38f   : > { %v1060_v5 = vsel %vm877_vm8, %v1056_v4, -inf }
 0x390   : > { %1061 = vmax.xlane.f32.xlu1 %v1060_v5  ;;  %v3174_v5 = vld [vmem:[%s4666_s6] ss:$0 sm:$0xff] }
 0x40d   : > { %v931_v6 = vpop.xlane.xlu1 %930 }
 0x40e   : > { %v935_v7 = vsub.f32 %v927_v50, %v931_v6  ;;  %v3644_v50 = vld [vmem:[%s4704_s3 + $0x8] sm:$0xff]  }
 0x40f   : > { %3440 = vmatpush3.bf16.msra.mxu1 %v3644_v50 }
 0x410   : > { %v937_v8 = vmul.f32 1.442695, %v935_v7  ;;  %3451 = vmatprep.subr.bf16.mxu1 %v3794_v2 }
 0x411   : > { %v934_v9 = vpop.xlane.xlu0 %933 }
 0x412   : > { %3709 = vpow2.f32 %v937_v8  ;;  %v936_v10 = vsub.f32 %v928_v56, %v934_v9 }
 0x414   : > { %v939_v11 = vmul.f32 1.442695, %v936_v10 }
 0x415   : > { %v1059_v12 = vpop.xlane.xlu0 %1058 }
 0x416   : > { %3711 = vpow2.f32 %v939_v11  ;;  %v1063_v13 = vsub.f32 %v1055_v61, %v1059_v12 }
 0x418   : > { %v1065_v14 = vmul.f32 1.442695, %v1063_v13 }
 0x419   : > { %v1062_v15 = vpop.xlane.xlu1 %1061 }
 0x41a   : > { %3713 = vpow2.f32 %v1065_v14  ;;  %v1064_v16 = vsub.f32 %v1056_v4, %v1062_v15 }
 0x41c   : > { %v1067_v17 = vmul.f32 1.442695, %v1064_v16 }
 0x41e   : > { %3715 = vpow2.f32 %v1067_v17 }
 0x41f   : > { %v3710_v20 = vpop.eup %3709 }
 0x420   : > { %v941_v21 = vsel %vm877_vm8, %v3710_v20, 0.0 }
 0x421   : > { %942 = vadd.xlane.f32.xlu0 %v941_v21 }
 0x423   : > { %v3712_v22 = vpop.eup %3711 }
 0x424   : > { %v944_v23 = vsel %vm877_vm8, %v3712_v22, 0.0 }
 0x425   : > { %945 = vadd.xlane.f32.xlu1 %v944_v23 }
 0x427   : > { %v3714_v26 = vpop.eup %3713 }
 0x428   : > { %v1069_v27 = vsel %vm877_vm8, %v3714_v26, 0.0 }
 0x429   : > { %1070 = vadd.xlane.f32.xlu0 %v1069_v27 }
 0x42b   : > { %v3716_v28 = vpop.eup %3715 }
 0x42c   : > { %v1072_v31 = vsel %vm877_vm8, %v3716_v28, 0.0 }
 0x42d   : > { %1073 = vadd.xlane.f32.xlu1 %v1072_v31 }
 0x43e   : > { %1080 = vrot.lane.b32.xlu1 %v4021_v39, %s4687_s30  ;;  %s4709_s30 = sshll.u32 %s3951_s1, 4 }
 0x43f   : > { %952 = vrot.lane.b32.xlu0 %v4021_v39, %s3801_s5  ;;  %s672_s4 = scalar_lea.vmem %s4681_s21, %s4709_s30 }
 0x4aa   : > { %v943_v32 = vpop.xlane.xlu0 %942 }
 0x4ab   : > { %3717 = vrcp.f32 %v943_v32  ;;  %v3646_v32 = vld [vmem:[%s4669_s9 + $0x20] sm:$0xff]  }
 0x4ae   : > { %v946_v33 = vpop.xlane.xlu1 %945 }
 0x4af   : > { %3719 = vrcp.f32 %v946_v33  ;;  %v3647_v33 = vld [vmem:[%s4669_s9 + $0x18] sm:$0xff]  }
 0x4b2   : > { %v1071_v34 = vpop.xlane.xlu0 %1070 }
 0x4b3   : > { %3721 = vrcp.f32 %v1071_v34  ;;  %v3648_v34 = vld [vmem:[%s4669_s9 + $0x10] sm:$0xff]  }
 0x4b6   : > { %v953_v35 = vpop.permute.xlu0 %952  ;;  %v1074_v36 = vpop.xlane.xlu1 %1073 }
 0x4b7   : > { %3723 = vrcp.f32 %v1074_v36  ;;  %3422 = vmatpush3.bf16.msra.mxu0 %v953_v35 }
 0x4b8   : > { %3433 = vmatprep.subr.bf16.mxu0 %v3794_v2  ;;  %v3718_v37 = vpop.eup %3717 }
 0x4b9   : > { %v948_v40 = vmul.f32 %v3718_v37, %v3710_v20 }
 0x4ba   : > { %v1081_v43 = vpop.permute.xlu1 %1080 }
 0x4bc   : > { %v3720_v38 = vpop.eup %3719 }
 0x4bd   : > { %v950_v41 = vmul.f32 %v3720_v38, %v3712_v22 }
 0x4bf   : > { %v951_v42 = vpack.c.bf16 %v950_v41, %v948_v40 }
 0x4c0   : > { %v3722_v39 = vpop.eup %3721 }
 0x4c1   : > { %3424 = vmatmul.mubr.msk.bf16.vlgmr.msra.gmra.mxu0 %vm877_vm8, %v951_v42  ;;  %v1076_v45 = vmul.f32 %v3722_v39, %v3714_v26 }
 0x4c2   : > { %3434 = vmatpush3.bf16.msra.mxu0 %v1081_v43  ;;  %3435 = vmatprep.mubr.msk.bf16.mxu0 %vm3795_vm1, %v3794_v2  ;;  %v3175_v43 = vld [vmem:[%s4667_s7] ss:$0 sm:$0xff] }
 0x4c3   : > { %3445 = vmatprep.subr.bf16.mxu0 %v3794_v2 }
 0x4c4   : > { %v3724_v44 = vpop.eup %3723 }
 0x4c5   : > { %v1078_v46 = vmul.f32 %v3724_v44, %v3716_v28  ;;  %v3176_v44 = vld [vmem:[%s4668_s8] ss:$0 sm:$0xff] }
 0x4c7   : > { %v1079_v48 = vpack.c.bf16 %v1078_v46, %v1076_v45 }
 0x4c9   : > { %3436 = vmatmul.mubr.msk.bf16.vlgmr.msra.gmra.mxu0 %vm877_vm8, %v1079_v48  ;;  %v3649_v48 = vld [vmem:[%s4669_s9 + $0x8] sm:$0xff]  }
 0x4ca   : > { %3447 = vmatprep.mubr.msk.bf16.mxu0 %vm3795_vm1, %v3794_v2  ;;  %3446 = vmatpush3.bf16.msra.mxu0 %v3643_v49 }
 0x4cb   : > { %1559 = vmatprep.subr.bf16.mxu0 %v3793_v1 }
 0x581   : > { %v992_v51 = vpop.f32.mrf.mxu0 }
 0x583   : > { %v3425_v53 = vpop.f32.mrf.mxu0 }
 0x585   : > { %v995_v54 = vpop.f32.mrf.mxu0 }
 0x586   : > { %v999_v55 = vpack.c.bf16 %v995_v54, %v992_v51  ;;  %v3650_v54 = vld [vmem:[%s4669_s9] sm:$0xff]  }
 0x587   : > { %v3426_v56 = vpop.f32.mrf.mxu0 }
 0x588   : > { %3448 = vmatmul.mubr.msk.bf16.vlgmr.msra.gmra.mxu0 %vm877_vm8, %v999_v55 }
 0x589   : > { %v1120_v57 = vpop.f32.mrf.mxu0 }
 0x58b   : > { %v3437_v58 = vpop.f32.mrf.mxu0 }
 0x58d   : > { %v1123_v59 = vpop.f32.mrf.mxu0 }
 0x58e   : > { %v1127_v60 = vpack.c.bf16 %v1123_v59, %v1120_v57  ;;  %v4136_v57 = vsel %vm709_vm12, 1.0, %v3794_v2 }
 0x58f   : > { %v3438_v61 = vpop.f32.mrf.mxu0 }
 0x590   : > { %3442 = vmatmul.mubr.msk.bf16.vlgmr.msra.gmra.mxu1 %vm877_vm8, %v1127_v60 }
 0x591   : > { %3463 = vmatprep.mubr.msk.bf16.mxu1 %vm3795_vm1, %v3794_v2 }
 0x648   : > { %v1224_v62 = vpop.f32.mrf.mxu0 }
 0x64a   : > { %v3449_v63 = vpop.f32.mrf.mxu0 }
 0x64c   : > { %v1227_v0 = vpop.f32.mrf.mxu0 }
 0x64e   : > { %v3450_v3 = vpop.f32.mrf.mxu0 }
 0x650   : > { %v1174_v4 = vpop.f32.mrf.mxu1 }
 0x651   : > { %v1225_v6 = vadd.f32 %v1224_v62, %v1174_v4 }
 0x652   : > { %v3443_v7 = vpop.f32.mrf.mxu1 }
 0x653   : > { %v1238_v8 = vadd.f32 %v3174_v5, %v1225_v6  ;;  %v4151_v7 = vsel %vm696_vm15, 1.0, %v3794_v2 }
 0x654   : > { %v1177_v9 = vpop.f32.mrf.mxu1 }
 0x655   : > { %v1228_v10 = vadd.f32 %v1227_v0, %v1177_v9  ;;  %v1240_v11 = vadd.f32 %v1238_v8, %v4008_v29 }
 0x656   : > { %v3444_v12 = vpop.f32.mrf.mxu1 }
 0x657   : > { %v1239_v13 = vadd.f32 %v3174_v5, %v1228_v10  ;;  %v1244_v14 = vsel %vm828_vm7, %v1240_v11, 0.0 }
 0x658   : > { %1245 = vadd.xlane.f32.xlu1 %v1244_v14 }
 0x659   : > { %v1241_v15 = vadd.f32 %v1239_v13, %v4011_v30  ;;  %v3645_v30 = vld [vmem:[%s4669_s9 + $0x28] sm:$0xff]  }
 0x65a   : > { %3452 = vmatpush3.bf16.msra.mxu1 %v3645_v30  ;;  %v3659_v30 = vld [vmem:[%s4671_s11 + $0x58] sm:$0xff]  }
 0x65b   : > { %v1247_v16 = vsel %vm828_vm7, %v1241_v15, 0.0  ;;  %3453 = vmatprep.subr.bf16.mxu1 %v3794_v2 }
 0x65c   : > { %1248 = vadd.xlane.f32.xlu0 %v1247_v16 }
 0x65e   : > { %3454 = vmatpush3.bf16.msra.mxu1 %v3646_v32  ;;  %v3660_v32 = vld [vmem:[%s4671_s11 + $0x50] sm:$0xff]  }
 0x65f   : > { %3455 = vmatprep.subr.bf16.mxu1 %v3794_v2 }
 0x662   : > { %3456 = vmatpush3.bf16.msra.mxu1 %v3647_v33  ;;  %v3661_v33 = vld [vmem:[%s4671_s11 + $0x48] sm:$0xff]  }
 0x663   : > { %3457 = vmatprep.subr.bf16.mxu1 %v3794_v2 }
 0x666   : > { %3458 = vmatpush3.bf16.msra.mxu1 %v3648_v34  ;;  %v3177_v34 = vld [vmem:[%s4670_s10] ss:$0 sm:$0xff] }
 0x667   : > { %3459 = vmatprep.subr.bf16.mxu1 %v3794_v2 }
 0x66a   : > { %3460 = vmatpush3.bf16.msra.mxu1 %v3649_v48 }
 0x66b   : > { %3461 = vmatprep.subr.bf16.mxu1 %v3794_v2 }
 0x66e   : > { %3462 = vmatpush3.bf16.msra.mxu1 %v3650_v54 }
 0x66f   : > { %3467 = vmatprep.subr.bf16.mxu1 %v3794_v2 }
 0x6e1   : > { %v1246_v17 = vpop.xlane.xlu1 %1245 }
 0x6e2   : > { %v1251_v20 = vmul.f32 0.03125, %v1246_v17 }
 0x6e4   : > { %v1253_v21 = vsub.f32 %v1240_v11, %v1251_v20 }
 0x6e5   : > { %v1249_v22 = vpop.xlane.xlu0 %1248 }
 0x6e6   : > { %v1252_v23 = vmul.f32 0.03125, %v1249_v22  ;;  %v1255_v26 = vmul.f32 %v1253_v21, %v1253_v21  ;;  %v3652_v22 = vld [vmem:[%s4671_s11 + $0x30] sm:$0xff]  }
 0x6e8   : > { %v1254_v27 = vsub.f32 %v1241_v15, %v1252_v23  ;;  %v1257_v28 = vsel %vm828_vm7, %v1255_v26, 0.0  ;;  %v3653_v23 = vld [vmem:[%s4671_s11 + $0x28] sm:$0xff]   ;;  %v3654_v26 = vld [vmem:[%s4671_s11 + $0x20] sm:$0xff]  }
 0x6e9   : > { %1258 = vadd.xlane.f32.xlu0 %v1257_v28  ;;  %v3656_v28 = vld [vmem:[%s4671_s11 + $0x10] sm:$0xff]  }
 0x6ea   : > { %v1256_v29 = vmul.f32 %v1254_v27, %v1254_v27 }
 0x6ec   : > { %v1260_v31 = vsel %vm828_vm7, %v1256_v29, 0.0  ;;  %v3657_v29 = vld [vmem:[%s4671_s11 + $0x8] sm:$0xff]  }
 0x6ed   : > { %1261 = vadd.xlane.f32.xlu1 %v1260_v31  ;;  %v3658_v31 = vld [vmem:[%s4671_s11] sm:$0xff]  }
 0x772   : > { %v1259_v35 = vpop.xlane.xlu0 %1258 }
 0x773   : > { %v1263_v36 = vmul.f32 0.03125, %v1259_v35 }
 0x775   : > { %v1265_v37 = vadd.f32 0.0001, %v1263_v36 }
 0x776   : > { %v1262_v38 = vpop.xlane.xlu1 %1261 }
 0x777   : > { %3725 = vrsqrt.f32 %v1265_v37  ;;  %v1264_v40 = vmul.f32 0.03125, %v1262_v38  ;;  %v3662_v37 = vld [vmem:[%s4671_s11 + $0x40] sm:$0xff]  }
 0x779   : > { %v1266_v41 = vadd.f32 0.0001, %v1264_v40 }
 0x77b   : > { %3727 = vrsqrt.f32 %v1266_v41 }
 0x784   : > { %v3726_v42 = vpop.eup %3725 }
 0x785   : > { %v1269_v39 = vmul.f32 %v3726_v42, %v1253_v21  ;;  %v3651_v21 = vld [vmem:[%s4671_s11 + $0x38] sm:$0xff]  }
 0x786   : > { %1560 = vmatpush1.bf16.msra.mxu0 %v3651_v21 }
 0x787   : > { %v1277_v45 = vmul.f32 %v3175_v43, %v1269_v39  ;;  %1561 = vmatprep.subr.bf16.mxu0 %v3793_v1 }
 0x788   : > { %v3728_v46 = vpop.eup %3727 }
 0x789   : > { %v1270_v49 = vmul.f32 %v3728_v46, %v1254_v27  ;;  %v4119_v50 = vadd.f32 %v3176_v44, %v1277_v45  ;;  %v3655_v27 = vld [vmem:[%s4671_s11 + $0x18] sm:$0xff]  }
 0x78a   : > { %1562 = vmatpush1.bf16.msra.mxu0 %v3652_v22 }
 0x78b   : > { %v1278_v51 = vmul.f32 %v3175_v43, %v1270_v49  ;;  %v1287_v53 = vmul.f32 %v4000_v24, %v4119_v50  ;;  %1563 = vmatprep.subr.bf16.mxu0 %v3793_v1 }
 0x78d   : > { %v4127_v55 = vadd.f32 %v3176_v44, %v1278_v51  ;;  %v1308_v58 = vrot.slane %v1287_v53, 1  ;;  %v1301_v62 = vrot.slane %v1287_v53, 7 }
 0x78e   : > { %1564 = vmatpush1.bf16.msra.mxu0 %v3653_v23 }
 0x78f   : > { %v1288_v56 = vmul.f32 %v4005_v25, %v4127_v55  ;;  %1565 = vmatprep.subr.bf16.mxu0 %v3793_v1 }
 0x791   : > { %v3593_v59 = vpack.i.bf16 %v1288_v56, %v1287_v53  ;;  %v1309_v60 = vrot.slane %v1288_v56, 1  ;;  %v1302_v61 = vrot.slane %v1288_v56, 7 }
 0x792   : > { %1566 = vmatpush1.bf16.msra.mxu0 %v3654_v26 }
 0x793   : > { %3594 = vrot.lane.b32.xlu0 %v3593_v59, %s4690_s24  ;;  %v1312_v19 = vsel %vm1310_vm14, %v1309_v60, %v1308_v58  ;;  %v1304_v63 = vsel %vm1303_vm13, %v1301_v62, %v1302_v61  ;;  %v1305_v0 = vsel %vm1303_vm13, %v1302_v61, %v1301_v62  ;;  %v1311_v4 = vsel %vm1310_vm14, %v1308_v58, %v1309_v60 }
 0x794   : > { %v1314_v3 = vmul.f32 %v4136_v57, %v1312_v19  ;;  %v1306_v10 = vmul.f32 %v4151_v7, %v1305_v0  ;;  %1567 = vmatprep.subr.bf16.mxu0 %v3793_v1 }
 0x796   : > { %v3598_v5 = vpack.i.bf16 %v1314_v3, %v1311_v4  ;;  %1568 = vmatpush1.bf16.msra.mxu0 %v3655_v27 }
 0x797   : > { %1569 = vmatprep.subr.bf16.mxu0 %v3793_v1 }
 0x798   : > { %3599 = vrot.lane.b32.xlu1 %v3598_v5, %s3801_s5 }
 0x79a   : > { %1570 = vmatpush1.bf16.msra.mxu0 %v3656_v28 }
 0x79b   : > { %1571 = vmatprep.subr.bf16.mxu0 %v3793_v1 }
 0x79e   : > { %1572 = vmatpush1.bf16.msra.mxu0 %v3657_v29 }
 0x79f   : > { %1573 = vmatprep.subr.bf16.mxu0 %v3793_v1 }
 0x7a2   : > { %1574 = vmatpush1.bf16.msra.mxu0 %v3658_v31 }
 0x7a3   : > { %1583 = vmatprep.subr.bf16.mxu0 %v3793_v1 }
 0x7a6   : > { %1584 = vmatpush2.bf16.msra.mxu0 %v3659_v30 }
 0x7a7   : > { %1585 = vmatprep.subr.bf16.mxu0 %v3793_v1 }
 0x7aa   : > { %1586 = vmatpush2.bf16.msra.mxu0 %v3660_v32 }
 0x7ab   : > { %1587 = vmatprep.subr.bf16.mxu0 %v3793_v1 }
 0x7ae   : > { %1588 = vmatpush2.bf16.msra.mxu0 %v3661_v33  ;;  %v3664_v33 = vld [vmem:[%s4702_s22 + $0x10] sm:$0xff]  }
 0x7af   : > { %1589 = vmatprep.subr.bf16.mxu0 %v3793_v1 }
 0x7b2   : > { %1590 = vmatpush2.bf16.msra.mxu0 %v3662_v37 }
 0x7b3   : > { %3493 = vmatprep.subr.bf16.mxu0 %v3794_v2 }
 0x805   : > { %v3595_v6 = vpop.permute.xlu0 %3594 }
 0x806   : > { %v3597_v8 = vunpack.i.h.bf16 %v3595_v6  ;;  %v3596_v9 = vunpack.i.l.bf16 %v3595_v6  ;;  %v3185_v6 = vld [vmem:[%s4672_s12] ss:$0 sm:$0xff] }
 0x808   : > { %v1331_v14 = vsel %vm828_vm7, %v1306_v10, %v3596_v9  ;;  %v1332_v15 = vsel %vm828_vm7, %v1304_v63, %v3597_v8 }
 0x80a   : > { %v3600_v11 = vpop.permute.xlu1 %3599 }
 0x80b   : > { %v3602_v12 = vunpack.i.h.bf16 %v3600_v11  ;;  %v3601_v13 = vunpack.i.l.bf16 %v3600_v11 }
 0x80d   : > { %v1334_v16 = vsel %vm1333_vm0, %v1331_v14, %v3601_v13  ;;  %v1335_v17 = vsel %vm1333_vm0, %v1332_v15, %v3602_v12 }
 0x80e   : > { %v1336_v20 = vpack.c.bf16 %v1335_v17, %v1334_v16 }
 0x810   : > { %3464 = vmatmul.mubr.msk.bf16.vlgmr.msra.gmra.mxu1 %vm1380_vm2, %v1336_v20 }
 0x811   : > { %3471 = vmatprep.mubr.msk.bf16.mxu1 %vm3795_vm1, %v3794_v2 }
 0x8d0   : > { %v1418_v35 = vpop.f32.mrf.mxu1 }
 0x8d1   : > { %v1419_v36 = vadd.f32 %v3177_v34, %v1418_v35 }
 0x8d2   : > { %v3465_v38 = vpop.f32.mrf.mxu1 }
 0x8d3   : > { %v1425_v40 = vmax.f32 %v1419_v36, 0.0 }
 0x8d4   : > { %v1421_v41 = vpop.f32.mrf.mxu1 }
 0x8d5   : > { %v1422_v42 = vadd.f32 %v3177_v34, %v1421_v41  ;;  %v1427_v43 = vmul.f32 %v4000_v24, %v1425_v40 }
 0x8d6   : > { %v3466_v39 = vpop.f32.mrf.mxu1 }
 0x8d7   : > { %v1426_v44 = vmax.f32 %v1422_v42, 0.0  ;;  %v1453_v46 = vrot.slane %v1427_v43, 7  ;;  %v1459_v48 = vrot.slane %v1427_v43, 1  ;;  %v3201_v42 = vld [vmem:[%s4667_s7 + $0x1] ss:$0 sm:$0xff] }
 0x8d9   : > { %v1428_v45 = vmul.f32 %v4005_v25, %v1426_v44 }
 0x8db   : > { %v1454_v49 = vrot.slane %v1428_v45, 7  ;;  %v1460_v51 = vrot.slane %v1428_v45, 1  ;;  %v3603_v53 = vpack.i.bf16 %v1428_v45, %v1427_v43  ;;  %v3202_v45 = vld [vmem:[%s4668_s8 + $0x1] ss:$0 sm:$0xff] }
 0x8dd   : > { %3604 = vrot.lane.b32.xlu1 %v3603_v53, %s3801_s5  ;;  %v1462_v54 = vsel %vm1310_vm14, %v1460_v51, %v1459_v48  ;;  %v1455_v56 = vsel %vm1303_vm13, %v1453_v46, %v1454_v49  ;;  %v1456_v58 = vsel %vm1303_vm13, %v1454_v49, %v1453_v46  ;;  %v1461_v60 = vsel %vm1310_vm14, %v1459_v48, %v1460_v51 }
 0x8de   : > { %v1464_v59 = vmul.f32 %v4136_v57, %v1462_v54  ;;  %v1457_v0 = vmul.f32 %v4151_v7, %v1456_v58 }
 0x8e0   : > { %v1476_v61 = vpack.c.bf16 %v1464_v59, %v1461_v60  ;;  %v3208_v59 = vld [vmem:[%s4703_s28 + $0x1] ss:$0 sm:$0xff] }
 0x8e2   : > { %3198 = vmatprep.mubr.msk.bf16.mxu0 %vm1333_vm0, %v1476_v61 }
 0x94f   : > { %v3605_v62 = vpop.permute.xlu1 %3604 }
 0x950   : > { %v3607_v19 = vunpack.i.h.bf16 %v3605_v62  ;;  %v3606_v63 = vunpack.i.l.bf16 %v3605_v62 }
 0x952   : > { %v1473_v3 = vsel %vm1333_vm0, %v1457_v0, %v3606_v63  ;;  %v1474_v4 = vsel %vm1333_vm0, %v1455_v56, %v3607_v19 }
 0x953   : > { %v1475_v5 = vpack.c.bf16 %v1474_v4, %v1473_v3 }
 0x955   : > { %1592 = vmatmul.mubr.bf16.vlgmr.msra.gmra.mxu0 %v1475_v5 }
 0x956   : > { %3495 = vmatprep.mubr.msk.bf16.mxu0 %vm3795_vm1, %v3794_v2 }
 0xa15   : > { %v1593_v8 = vpop.f32.mrf.mxu0 }
 0xa16   : > { %v1594_v9 = vadd.f32 %v3185_v6, %v1593_v8 }
 0xa17   : > { %v1595_v10 = vpop.f32.mrf.mxu0 }
 0xa18   : > { %v1600_v11 = vmul.f32 %v4000_v24, %v1594_v9 }
 0xa19   : > { %v1596_v12 = vpop.f32.mrf.mxu0 }
 0xa1a   : > { %v1597_v13 = vadd.f32 %v3185_v6, %v1596_v12  ;;  %v1602_v14 = vadd.f32 %v1600_v11, %v4119_v50 }
 0xa1b   : > { %v1598_v15 = vpop.f32.mrf.mxu0 }
 0xa1c   : > { %v1601_v16 = vmul.f32 %v4005_v25, %v1597_v13  ;;  %v1608_v17 = vsel %vm828_vm7, %v1602_v14, 0.0 }
 0xa1d   : > { %1609 = vadd.xlane.f32.xlu0 %v1608_v17 }
 0xa1e   : > { %v1603_v20 = vadd.f32 %v1601_v16, %v4127_v55  ;;  %v3663_v55 = vld [vmem:[%s4702_s22 + $0x18] sm:$0xff]  }
 0xa1f   : > { %3468 = vmatpush3.bf16.msra.mxu1 %v3663_v55 }
 0xa20   : > { %v1611_v21 = vsel %vm828_vm7, %v1603_v20, 0.0  ;;  %3469 = vmatprep.subr.bf16.mxu1 %v3794_v2 }
 0xa21   : > { %1612 = vadd.xlane.f32.xlu1 %v1611_v21 }
 0xa23   : > { %3470 = vmatpush3.bf16.msra.mxu1 %v3664_v33 }
 0xa24   : > { %3475 = vmatprep.subr.bf16.mxu1 %v3794_v2 }
 0xaa6   : > { %v1610_v22 = vpop.xlane.xlu0 %1609 }
 0xaa7   : > { %v1614_v23 = vmul.f32 0.03125, %v1610_v22 }
 0xaa9   : > { %v1616_v26 = vsub.f32 %v1602_v14, %v1614_v23 }
 0xaaa   : > { %v1613_v27 = vpop.xlane.xlu1 %1612 }
 0xaab   : > { %v1615_v28 = vmul.f32 0.03125, %v1613_v27  ;;  %v1618_v29 = vmul.f32 %v1616_v26, %v1616_v26 }
 0xaad   : > { %v1617_v31 = vsub.f32 %v1603_v20, %v1615_v28  ;;  %v1620_v50 = vsel %vm828_vm7, %v1618_v29, 0.0 }
 0xaae   : > { %1621 = vadd.xlane.f32.xlu0 %v1620_v50 }
 0xaaf   : > { %v1619_v30 = vmul.f32 %v1617_v31, %v1617_v31 }
 0xab1   : > { %v1623_v32 = vsel %vm828_vm7, %v1619_v30, 0.0 }
 0xab2   : > { %1624 = vadd.xlane.f32.xlu0 %v1623_v32 }
 0xb37   : > { %v1622_v34 = vpop.xlane.xlu0 %1621 }
 0xb38   : > { %v1626_v35 = vmul.f32 0.03125, %v1622_v34 }
 0xb3a   : > { %v1628_v36 = vadd.f32 0.0001, %v1626_v35 }
 0xb3b   : > { %v1625_v37 = vpop.xlane.xlu0 %1624 }
 0xb3c   : > { %3729 = vrsqrt.f32 %v1628_v36  ;;  %v1627_v38 = vmul.f32 0.03125, %v1625_v37 }
 0xb3e   : > { %v1629_v40 = vadd.f32 0.0001, %v1627_v38 }
 0xb40   : > { %3731 = vrsqrt.f32 %v1629_v40 }
 0xb49   : > { %v3730_v41 = vpop.eup %3729 }
 0xb4a   : > { %v1632_v43 = vmul.f32 %v3730_v41, %v1616_v26 }
 0xb4c   : > { %v1640_v39 = vmul.f32 %v3201_v42, %v1632_v43 }
 0xb4d   : > { %v3732_v44 = vpop.eup %3731 }
 0xb4e   : > { %v1633_v46 = vmul.f32 %v3732_v44, %v1617_v31  ;;  %v1648_v49 = vadd.f32 %v3202_v45, %v1640_v39 }
 0xb50   : > { %v1641_v48 = vmul.f32 %v3201_v42, %v1633_v46  ;;  %v4256_v53 = vmul.f32 %v4000_v24, %v1648_v49 }
 0xb52   : > { %v1649_v51 = vadd.f32 %v3202_v45, %v1641_v48 }
 0xb54   : > { %v4259_v54 = vmul.f32 %v4005_v25, %v1649_v51 }
 0xb56   : > { %v1652_v56 = vpack.c.bf16 %v4259_v54, %v4256_v53 }
 0xb58   : > { %3472 = vmatmul.mubr.msk.bf16.vlgmr.msra.gmra.mxu1 %vm828_vm7, %v1652_v56 }
 0xb59   : > { %3477 = vmatprep.mubr.msk.bf16.mxu1 %vm3795_vm1, %v3794_v2 }
 0xc18   : > { %v1715_v58 = vpop.f32.mrf.mxu1 }
 0xc19   : > { %v1716_v62 = vadd.f32 %v3208_v59, %v1715_v58 }
 0xc1a   : > { %v3473_v60 = vpop.f32.mrf.mxu1 }
 0xc1c   : > { %v1718_v61 = vpop.f32.mrf.mxu1 }
 0xc1d   : > { %v1719_v19 = vadd.f32 %v3208_v59, %v1718_v61 }
 0xc1e   : > { %v3474_v63 = vpop.f32.mrf.mxu1 }
 0xc1f   : > { %v4269_v0 = vpack.c.bf16 %v1719_v19, %v1716_v62 }
 0xc21   : > { %1724 = vrot.lane.b32.xlu1 %v4269_v0, %s3797_s0  ;;  %s4706_s0 = smov 80  }
 0xc25   : > { %1800 = vrot.lane.b32.xlu1 %v4269_v0, %s3801_s5 }
 0xc29   : > { %1851 = vrot.lane.b32.xlu1 %v4269_v0, %s4705_s2 }
 0xc93   : > { %v1725_v3 = vpop.permute.xlu1 %1724 }
 0xc94   : > { %v1730_v4 = vsel %vm877_vm8, %v1725_v3, 0 }
 0xc95   : > { %3476 = vmatpush3.bf16.xpose.msra.mxu1 %v1730_v4 }
 0xc96   : > { %3481 = vmatprep.subr.bf16.mxu1 %v3794_v2 }
 0xc97   : > { %v1801_v5 = vpop.permute.xlu1 %1800 }
 0xc9b   : > { %v1852_v38 = vpop.permute.xlu1 %1851 }
 0xc9c   : > { %3478 = vmatmul.mubr.msk.bf16.vlgmr.msra.gmra.mxu1 %vm877_vm8, %v4269_v0 }
 0xc9d   : > { %3482 = vmatpush3.bf16.msra.mxu1 %v1801_v5  ;;  %3483 = vmatprep.mubr.msk.bf16.mxu1 %vm3795_vm1, %v3794_v2 }
 0xc9e   : > { %3487 = vmatprep.subr.bf16.mxu1 %v3794_v2 }
 0xd5c   : > { %v1766_v6 = vpop.f32.mrf.mxu1 }
 0xd5d   : > { %v1773_v8 = vmul.f32 0.25, %v1766_v6 }
 0xd5e   : > { %v3479_v9 = vpop.f32.mrf.mxu1 }
 0xd5f   : > { %v1775_v10 = vadd.f32 %v1773_v8, %v4043_v47 }
 0xd60   : > { %v1769_v11 = vpop.f32.mrf.mxu1 }
 0xd61   : > { %v1774_v12 = vmul.f32 0.25, %v1769_v11  ;;  %v1777_v13 = vsel %vm877_vm8, %v1775_v10, -inf }
 0xd62   : > { %1778 = vmax.xlane.f32.xlu0 %v1777_v13  ;;  %v3480_v14 = vpop.f32.mrf.mxu1 }
 0xd63   : > { %v1776_v15 = vadd.f32 %v1774_v12, %v4048_v52 }
 0xd65   : > { %v1780_v16 = vsel %vm877_vm8, %v1776_v15, -inf }
 0xd66   : > { %1781 = vmax.xlane.f32.xlu0 %v1780_v16 }
 0xdeb   : > { %v1779_v17 = vpop.xlane.xlu0 %1778 }
 0xdec   : > { %v1783_v20 = vsub.f32 %v1775_v10, %v1779_v17 }
 0xdee   : > { %v1785_v21 = vmul.f32 1.442695, %v1783_v20 }
 0xdef   : > { %v1782_v22 = vpop.xlane.xlu0 %1781 }
 0xdf0   : > { %3733 = vpow2.f32 %v1785_v21  ;;  %v1784_v23 = vsub.f32 %v1776_v15, %v1782_v22  ;;  %v3665_v15 = vld [vmem:[%s4704_s3 + $0x10] sm:$0xff]  }
 0xdf2   : > { %v1787_v26 = vmul.f32 1.442695, %v1784_v23 }
 0xdf4   : > { %3735 = vpow2.f32 %v1787_v26 }
 0xdfd   : > { %v3734_v27 = vpop.eup %3733 }
 0xdfe   : > { %v1789_v28 = vsel %vm877_vm8, %v3734_v27, 0.0 }
 0xdff   : > { %1790 = vadd.xlane.f32.xlu0 %v1789_v28 }
 0xe01   : > { %v3736_v29 = vpop.eup %3735 }
 0xe02   : > { %v1792_v31 = vsel %vm877_vm8, %v3736_v29, 0.0 }
 0xe03   : > { %1793 = vadd.xlane.f32.xlu0 %v1792_v31 }
 0xe19   : > { %1853 = vrot.lane.b32.xlu0 %v4269_v0, %s4706_s0 }
 0xe88   : > { %v1791_v50 = vpop.xlane.xlu0 %1790 }
 0xe89   : > { %3737 = vrcp.f32 %v1791_v50  ;;  %v3225_v50 = vld [vmem:[%s4666_s6 + $0x1] ss:$0 sm:$0xff] }
 0xe8c   : > { %v1794_v30 = vpop.xlane.xlu0 %1793 }
 0xe8d   : > { %3739 = vrcp.f32 %v1794_v30 }
 0xe90   : > { %v1854_v35 = vpop.permute.xlu0 %1853 }
 0xe91   : > { %v1859_v37 = vsel %vm877_vm8, %v1854_v35, 0 }
 0xe96   : > { %v3738_v32 = vpop.eup %3737 }
 0xe97   : > { %v1796_v33 = vmul.f32 %v3738_v32, %v3734_v27 }
 0xe9a   : > { %v3740_v55 = vpop.eup %3739 }
 0xe9b   : > { %v1798_v34 = vmul.f32 %v3740_v55, %v3736_v29 }
 0xe9d   : > { %v1799_v36 = vpack.c.bf16 %v1798_v34, %v1796_v33 }
 0xe9f   : > { %3484 = vmatmul.mubr.msk.bf16.vlgmr.msra.gmra.mxu1 %vm877_vm8, %v1799_v36 }
 0xea0   : > { %3488 = vmatpush3.bf16.xpose.msra.mxu1 %v1859_v37  ;;  %3489 = vmatprep.mubr.msk.bf16.mxu1 %vm3795_vm1, %v3794_v2 }
 0xea1   : > { %3499 = vmatprep.subr.bf16.mxu1 %v3794_v2 }
 0xea7   : > { %3490 = vmatmul.mubr.msk.bf16.vlgmr.msra.gmra.mxu1 %vm877_vm8, %v1852_v38 }
 0xea8   : > { %3501 = vmatprep.mubr.msk.bf16.mxu1 %vm3795_vm1, %v3794_v2 }
 0xf5f   : > { %v1840_v40 = vpop.f32.mrf.mxu1 }
 0xf61   : > { %v3485_v41 = vpop.f32.mrf.mxu1 }
 0xf63   : > { %v1843_v42 = vpop.f32.mrf.mxu1 }
 0xf64   : > { %v1847_v43 = vpack.c.bf16 %v1843_v42, %v1840_v40 }
 0xf65   : > { %v3486_v39 = vpop.f32.mrf.mxu1 }
 0xf67   : > { %v1895_v44 = vpop.f32.mrf.mxu1 }
 0xf68   : > { %v1902_v45 = vmul.f32 0.25, %v1895_v44 }
 0xf69   : > { %v3491_v46 = vpop.f32.mrf.mxu1 }
 0xf6a   : > { %v1904_v48 = vadd.f32 %v1902_v45, %v4043_v47 }
 0xf6b   : > { %v1898_v49 = vpop.f32.mrf.mxu1 }
 0xf6c   : > { %v1903_v51 = vmul.f32 0.25, %v1898_v49  ;;  %v1906_v56 = vsel %vm877_vm8, %v1904_v48, -inf }
 0xf6d   : > { %1907 = vmax.xlane.f32.xlu1 %v1906_v56  ;;  %v3492_v58 = vpop.f32.mrf.mxu1  ;;  %v3668_v56 = vld [vmem:[%s4669_s9 + $0x50] sm:$0xff]  }
 0xf6e   : > { %v1905_v59 = vadd.f32 %v1903_v51, %v4048_v52  ;;  %v3669_v58 = vld [vmem:[%s4669_s9 + $0x48] sm:$0xff]  }
 0xf70   : > { %v1909_v60 = vsel %vm877_vm8, %v1905_v59, -inf }
 0xf71   : > { %1910 = vmax.xlane.f32.xlu0 %v1909_v60 }
 0xff6   : > { %v1908_v61 = vpop.xlane.xlu1 %1907 }
 0xff7   : > { %v1912_v62 = vsub.f32 %v1904_v48, %v1908_v61 }
 0xff9   : > { %v1914_v19 = vmul.f32 1.442695, %v1912_v62 }
 0xffa   : > { %v1911_v63 = vpop.xlane.xlu0 %1910 }
 0xffb   : > { %3741 = vpow2.f32 %v1914_v19  ;;  %v1913_v3 = vsub.f32 %v1905_v59, %v1911_v63  ;;  %v3670_v59 = vld [vmem:[%s4669_s9 + $0x40] sm:$0xff]  }
 0xffd   : > { %v1916_v4 = vmul.f32 1.442695, %v1913_v3 }
 0xfff   : > { %3743 = vpow2.f32 %v1916_v4 }
0x1008   : > { %v3742_v47 = vpop.eup %3741 }
0x1009   : > { %v1918_v5 = vsel %vm877_vm8, %v3742_v47, 0.0 }
0x100a   : > { %1919 = vadd.xlane.f32.xlu1 %v1918_v5 }
0x100c   : > { %v3744_v6 = vpop.eup %3743 }
0x100d   : > { %v1921_v8 = vsel %vm877_vm8, %v3744_v6, 0.0 }
0x100e   : > { %1922 = vadd.xlane.f32.xlu1 %v1921_v8 }
0x101f   : > { %1929 = vrot.lane.b32.xlu1 %v4269_v0, %s4707_s25  ;;  %v3666_v0 = vld [vmem:[%s4704_s3 + $0x18] sm:$0xff]  }
0x1020   : > { %3500 = vmatpush3.bf16.msra.mxu1 %v3666_v0 }
0x1021   : > { %3511 = vmatprep.subr.bf16.mxu1 %v3794_v2 }
0x1093   : > { %v1920_v52 = vpop.xlane.xlu1 %1919 }
0x1094   : > { %3745 = vrcp.f32 %v1920_v52 }
0x1097   : > { %v1923_v9 = vpop.xlane.xlu1 %1922 }
0x1098   : > { %3747 = vrcp.f32 %v1923_v9  ;;  %v3671_v9 = vld [vmem:[%s4669_s9 + $0x38] sm:$0xff]  }
0x109b   : > { %v1930_v10 = vpop.permute.xlu1 %1929 }
0x109c   : > { %3494 = vmatpush3.bf16.msra.mxu0 %v1930_v10 }
0x109d   : > { %3505 = vmatprep.subr.bf16.mxu0 %v3794_v2 }
0x10a1   : > { %v3746_v11 = vpop.eup %3745 }
0x10a2   : > { %v1925_v13 = vmul.f32 %v3746_v11, %v3742_v47  ;;  %v3228_v47 = vld [vmem:[%s4667_s7 + $0x2] ss:$0 sm:$0xff] }
0x10a5   : > { %v3748_v12 = vpop.eup %3747 }
0x10a6   : > { %v1927_v14 = vmul.f32 %v3748_v12, %v3744_v6  ;;  %v3229_v6 = vld [vmem:[%s4668_s8 + $0x2] ss:$0 sm:$0xff] }
0x10a8   : > { %v1928_v16 = vpack.c.bf16 %v1927_v14, %v1925_v13  ;;  %v3672_v14 = vld [vmem:[%s4669_s9 + $0x30] sm:$0xff]  }
0x10aa   : > { %3496 = vmatmul.mubr.msk.bf16.vlgmr.msra.gmra.mxu0 %vm877_vm8, %v1928_v16 }
0x10ab   : > { %3506 = vmatpush3.bf16.msra.mxu0 %v3665_v15  ;;  %3507 = vmatprep.mubr.msk.bf16.mxu0 %vm3795_vm1, %v3794_v2 }
0x10ac   : > { %2410 = vmatprep.subr.bf16.mxu0 %v3793_v1 }
0x10b2   : > { %3508 = vmatmul.mubr.msk.bf16.vlgmr.msra.gmra.mxu0 %vm877_vm8, %v1847_v43 }
0x116a   : > { %v1969_v17 = vpop.f32.mrf.mxu0 }
0x116c   : > { %v3497_v20 = vpop.f32.mrf.mxu0 }
0x116e   : > { %v1972_v21 = vpop.f32.mrf.mxu0 }
0x116f   : > { %v1976_v22 = vpack.c.bf16 %v1972_v21, %v1969_v17 }
0x1170   : > { %v3498_v23 = vpop.f32.mrf.mxu0 }
0x1171   : > { %3502 = vmatmul.mubr.msk.bf16.vlgmr.msra.gmra.mxu1 %vm877_vm8, %v1976_v22 }
0x1172   : > { %v2073_v26 = vpop.f32.mrf.mxu0  ;;  %3523 = vmatprep.mubr.msk.bf16.mxu1 %vm3795_vm1, %v3794_v2 }
0x1174   : > { %v3509_v27 = vpop.f32.mrf.mxu0 }
0x1176   : > { %v2076_v28 = vpop.f32.mrf.mxu0 }
0x1178   : > { %v3510_v29 = vpop.f32.mrf.mxu0 }
0x1231   : > { %v2023_v31 = vpop.f32.mrf.mxu1 }
0x1232   : > { %v2074_v30 = vadd.f32 %v2073_v26, %v2023_v31 }
0x1233   : > { %v3503_v32 = vpop.f32.mrf.mxu1 }
0x1234   : > { %v2088_v55 = vadd.f32 %v3225_v50, %v2074_v30 }
0x1235   : > { %v2026_v33 = vpop.f32.mrf.mxu1 }
0x1236   : > { %v2077_v34 = vadd.f32 %v2076_v28, %v2026_v33  ;;  %v2090_v35 = vadd.f32 %v2088_v55, %v4256_v53 }
0x1237   : > { %v3504_v36 = vpop.f32.mrf.mxu1 }
0x1238   : > { %v2089_v37 = vadd.f32 %v3225_v50, %v2077_v34  ;;  %v2096_v38 = vsel %vm828_vm7, %v2090_v35, 0.0 }
0x1239   : > { %2097 = vadd.xlane.f32.xlu0 %v2096_v38 }
0x123a   : > { %v2091_v40 = vadd.f32 %v2089_v37, %v4259_v54  ;;  %v3667_v54 = vld [vmem:[%s4669_s9 + $0x58] sm:$0xff]  }
0x123b   : > { %3512 = vmatpush3.bf16.msra.mxu1 %v3667_v54  ;;  %v3683_v54 = vld [vmem:[%s4671_s11 + $0xa8] sm:$0xff]  }
0x123c   : > { %v2099_v41 = vsel %vm828_vm7, %v2091_v40, 0.0  ;;  %3513 = vmatprep.subr.bf16.mxu1 %v3794_v2 }
0x123d   : > { %2100 = vadd.xlane.f32.xlu0 %v2099_v41 }
0x123f   : > { %3514 = vmatpush3.bf16.msra.mxu1 %v3668_v56  ;;  %v3243_v56 = vld [vmem:[%s4670_s10 + $0x1] ss:$0 sm:$0xff] }
0x1240   : > { %3515 = vmatprep.subr.bf16.mxu1 %v3794_v2 }
0x1243   : > { %3516 = vmatpush3.bf16.msra.mxu1 %v3669_v58 }
0x1244   : > { %3517 = vmatprep.subr.bf16.mxu1 %v3794_v2 }
0x1247   : > { %3518 = vmatpush3.bf16.msra.mxu1 %v3670_v59 }
0x1248   : > { %3519 = vmatprep.subr.bf16.mxu1 %v3794_v2 }
0x124b   : > { %3520 = vmatpush3.bf16.msra.mxu1 %v3671_v9 }
0x124c   : > { %3521 = vmatprep.subr.bf16.mxu1 %v3794_v2 }
0x124f   : > { %3522 = vmatpush3.bf16.msra.mxu1 %v3672_v14 }
0x1250   : > { %3527 = vmatprep.subr.bf16.mxu1 %v3794_v2 }
0x12c2   : > { %v2098_v42 = vpop.xlane.xlu0 %2097 }
0x12c3   : > { %v2102_v43 = vmul.f32 0.03125, %v2098_v42  ;;  %v3673_v42 = vld [vmem:[%s4671_s11 + $0x98] sm:$0xff]  }
0x12c4   : > { %2411 = vmatpush1.bf16.msra.mxu0 %v3673_v42 }
0x12c5   : > { %v2104_v39 = vsub.f32 %v2090_v35, %v2102_v43  ;;  %v3674_v43 = vld [vmem:[%s4671_s11 + $0x90] sm:$0xff]   ;;  %2412 = vmatprep.subr.bf16.mxu0 %v3793_v1 }
0x12c6   : > { %v2101_v44 = vpop.xlane.xlu0 %2100 }
0x12c7   : > { %v2103_v45 = vmul.f32 0.03125, %v2101_v44  ;;  %v2106_v46 = vmul.f32 %v2104_v39, %v2104_v39  ;;  %v3676_v44 = vld [vmem:[%s4671_s11 + $0x80] sm:$0xff]  }
0x12c8   : > { %2413 = vmatpush1.bf16.msra.mxu0 %v3674_v43 }
0x12c9   : > { %v2105_v48 = vsub.f32 %v2091_v40, %v2103_v45  ;;  %v2108_v49 = vsel %vm828_vm7, %v2106_v46, 0.0  ;;  %2414 = vmatprep.subr.bf16.mxu0 %v3793_v1  ;;  %v3677_v45 = vld [vmem:[%s4671_s11 + $0x78] sm:$0xff]   ;;  %v3678_v46 = vld [vmem:[%s4671_s11 + $0x70] sm:$0xff]  }
0x12ca   : > { %2109 = vadd.xlane.f32.xlu0 %v2108_v49  ;;  %v3680_v49 = vld [vmem:[%s4671_s11 + $0x60] sm:$0xff]  }
0x12cb   : > { %v2107_v53 = vmul.f32 %v2105_v48, %v2105_v48 }
0x12cd   : > { %v2111_v51 = vsel %vm828_vm7, %v2107_v53, 0.0  ;;  %v3681_v53 = vld [vmem:[%s4671_s11 + $0xb8] sm:$0xff]  }
0x12ce   : > { %2112 = vadd.xlane.f32.xlu0 %v2111_v51  ;;  %v3682_v51 = vld [vmem:[%s4671_s11 + $0xb0] sm:$0xff]  }
0x1353   : > { %v2110_v60 = vpop.xlane.xlu0 %2109 }
0x1354   : > { %v2114_v61 = vmul.f32 0.03125, %v2110_v60  ;;  %v3684_v60 = vld [vmem:[%s4671_s11 + $0xa0] sm:$0xff]  }
0x1356   : > { %v2116_v62 = vadd.f32 0.0001, %v2114_v61 }
0x1357   : > { %v2113_v19 = vpop.xlane.xlu0 %2112 }
0x1358   : > { %3749 = vrsqrt.f32 %v2116_v62  ;;  %v2115_v63 = vmul.f32 0.03125, %v2113_v19 }
0x135a   : > { %v2117_v3 = vadd.f32 0.0001, %v2115_v63 }
0x135c   : > { %3751 = vrsqrt.f32 %v2117_v3 }
0x1365   : > { %v3750_v4 = vpop.eup %3749 }
0x1366   : > { %v2120_v5 = vmul.f32 %v3750_v4, %v2104_v39  ;;  %v3675_v39 = vld [vmem:[%s4671_s11 + $0x88] sm:$0xff]  }
0x1367   : > { %2415 = vmatpush1.bf16.msra.mxu0 %v3675_v39 }
0x1368   : > { %v2128_v8 = vmul.f32 %v3228_v47, %v2120_v5  ;;  %2416 = vmatprep.subr.bf16.mxu0 %v3793_v1 }
0x1369   : > { %v3752_v52 = vpop.eup %3751 }
0x136a   : > { %v2121_v10 = vmul.f32 %v3752_v52, %v2105_v48  ;;  %v4358_v11 = vadd.f32 %v3229_v6, %v2128_v8  ;;  %v3679_v48 = vld [vmem:[%s4671_s11 + $0x68] sm:$0xff]  }
0x136b   : > { %2417 = vmatpush1.bf16.msra.mxu0 %v3676_v44 }
0x136c   : > { %v2129_v12 = vmul.f32 %v3228_v47, %v2121_v10  ;;  %v2138_v13 = vmul.f32 %v4000_v24, %v4358_v11  ;;  %2418 = vmatprep.subr.bf16.mxu0 %v3793_v1 }
0x136e   : > { %v4366_v15 = vadd.f32 %v3229_v6, %v2129_v12  ;;  %v2159_v0 = vrot.slane %v2138_v13, 1  ;;  %v2153_v21 = vrot.slane %v2138_v13, 7 }
0x136f   : > { %2419 = vmatpush1.bf16.msra.mxu0 %v3677_v45 }
0x1370   : > { %v2139_v16 = vmul.f32 %v4005_v25, %v4366_v15  ;;  %2420 = vmatprep.subr.bf16.mxu0 %v3793_v1 }
0x1372   : > { %v3608_v17 = vpack.i.bf16 %v2139_v16, %v2138_v13  ;;  %v2160_v20 = vrot.slane %v2139_v16, 1  ;;  %v2154_v22 = vrot.slane %v2139_v16, 7 }
0x1373   : > { %2421 = vmatpush1.bf16.msra.mxu0 %v3678_v46 }
0x1374   : > { %3609 = vrot.lane.b32.xlu1 %v3608_v17, %s4708_s20  ;;  %v2162_v23 = vsel %vm1310_vm14, %v2160_v20, %v2159_v0  ;;  %v2155_v26 = vsel %vm1303_vm13, %v2153_v21, %v2154_v22  ;;  %v2156_v27 = vsel %vm1303_vm13, %v2154_v22, %v2153_v21  ;;  %v2161_v29 = vsel %vm1310_vm14, %v2159_v0, %v2160_v20 }
0x1375   : > { %v2164_v28 = vmul.f32 %v4136_v57, %v2162_v23  ;;  %v2157_v55 = vmul.f32 %v4151_v7, %v2156_v27  ;;  %2422 = vmatprep.subr.bf16.mxu0 %v3793_v1 }
0x1377   : > { %v3613_v31 = vpack.i.bf16 %v2164_v28, %v2161_v29  ;;  %2423 = vmatpush1.bf16.msra.mxu0 %v3679_v48  ;;  %v3276_v29 = vld [vmem:[%s4672_s12 + $0x1] ss:$0 sm:$0xff] }
0x1378   : > { %2424 = vmatprep.subr.bf16.mxu0 %v3793_v1 }
0x1379   : > { %3614 = vrot.lane.b32.xlu0 %v3613_v31, %s3801_s5 }
0x137b   : > { %2425 = vmatpush1.bf16.msra.mxu0 %v3680_v49 }
0x137c   : > { %2434 = vmatprep.subr.bf16.mxu0 %v3793_v1 }
0x137f   : > { %2435 = vmatpush2.bf16.msra.mxu0 %v3681_v53  ;;  %v3686_v53 = vld [vmem:[%s4673_s13] sm:$0xff]  }
0x1380   : > { %2436 = vmatprep.subr.bf16.mxu0 %v3793_v1 }
0x1383   : > { %2437 = vmatpush2.bf16.msra.mxu0 %v3682_v51 }
0x1384   : > { %2438 = vmatprep.subr.bf16.mxu0 %v3793_v1 }
0x1387   : > { %2439 = vmatpush2.bf16.msra.mxu0 %v3683_v54 }
0x1388   : > { %2440 = vmatprep.subr.bf16.mxu0 %v3793_v1 }
0x138b   : > { %2441 = vmatpush2.bf16.msra.mxu0 %v3684_v60 }
0x138c   : > { %2886 = vmatprep.subr.bf16.mxu0 %v3793_v1 }
0x13e6   : > { %v3610_v50 = vpop.permute.xlu1 %3609 }
0x13e7   : > { %v3612_v30 = vunpack.i.h.bf16 %v3610_v50  ;;  %v3611_v32 = vunpack.i.l.bf16 %v3610_v50 }
0x13e9   : > { %v2181_v36 = vsel %vm828_vm7, %v2157_v55, %v3611_v32  ;;  %v2182_v37 = vsel %vm828_vm7, %v2155_v26, %v3612_v30 }
0x13eb   : > { %v3615_v33 = vpop.permute.xlu0 %3614 }
0x13ec   : > { %v3617_v34 = vunpack.i.h.bf16 %v3615_v33  ;;  %v3616_v35 = vunpack.i.l.bf16 %v3615_v33 }
0x13ee   : > { %v2183_v38 = vsel %vm1333_vm0, %v2181_v36, %v3616_v35  ;;  %v2184_v40 = vsel %vm1333_vm0, %v2182_v37, %v3617_v34 }
0x13ef   : > { %v2185_v41 = vpack.c.bf16 %v2184_v40, %v2183_v38 }
0x13f1   : > { %3524 = vmatmul.mubr.msk.bf16.vlgmr.msra.gmra.mxu1 %vm1380_vm2, %v2185_v41 }
0x13f2   : > { %3531 = vmatprep.mubr.msk.bf16.mxu1 %vm3795_vm1, %v3794_v2 }
0x14b1   : > { %v2267_v58 = vpop.f32.mrf.mxu1 }
0x14b2   : > { %v2268_v59 = vadd.f32 %v3243_v56, %v2267_v58 }
0x14b3   : > { %v3525_v61 = vpop.f32.mrf.mxu1 }
0x14b4   : > { %v2274_v62 = vmax.f32 %v2268_v59, 0.0 }
0x14b5   : > { %v2270_v19 = vpop.f32.mrf.mxu1 }
0x14b6   : > { %v2271_v63 = vadd.f32 %v3243_v56, %v2270_v19  ;;  %v2276_v3 = vmul.f32 %v4000_v24, %v2274_v62  ;;  %v3292_v62 = vld [vmem:[%s4667_s7 + $0x3] ss:$0 sm:$0xff] }
0x14b7   : > { %v3526_v4 = vpop.f32.mrf.mxu1 }
0x14b8   : > { %v2275_v47 = vmax.f32 %v2271_v63, 0.0  ;;  %v2303_v6 = vrot.slane %v2276_v3, 7  ;;  %v2309_v8 = vrot.slane %v2276_v3, 1  ;;  %v3293_v63 = vld [vmem:[%s4668_s8 + $0x3] ss:$0 sm:$0xff] }
0x14ba   : > { %v2277_v5 = vmul.f32 %v4005_v25, %v2275_v47 }
0x14bc   : > { %v2304_v52 = vrot.slane %v2277_v5, 7  ;;  %v2310_v9 = vrot.slane %v2277_v5, 1  ;;  %v3618_v10 = vpack.i.bf16 %v2277_v5, %v2276_v3 }
0x14be   : > { %3619 = vrot.lane.b32.xlu1 %v3618_v10, %s3801_s5  ;;  %v2312_v12 = vsel %vm1310_vm14, %v2310_v9, %v2309_v8  ;;  %v2305_v13 = vsel %vm1303_vm13, %v2303_v6, %v2304_v52  ;;  %v2306_v14 = vsel %vm1303_vm13, %v2304_v52, %v2303_v6  ;;  %v2311_v0 = vsel %vm1310_vm14, %v2309_v8, %v2310_v9 }
0x14bf   : > { %v2314_v16 = vmul.f32 %v4136_v57, %v2312_v12  ;;  %v2307_v23 = vmul.f32 %v4151_v7, %v2306_v14  ;;  %v3687_v12 = vld [vmem:[%s4675_s15 + $0x28] sm:$0xff]  }
0x14c1   : > { %v2326_v17 = vpack.c.bf16 %v2314_v16, %v2311_v0 }
0x14c3   : > { %3289 = vmatprep.mubr.msk.bf16.mxu0 %vm1333_vm0, %v2326_v17 }
0x1530   : > { %v3620_v20 = vpop.permute.xlu1 %3619 }
0x1531   : > { %v3622_v21 = vunpack.i.h.bf16 %v3620_v20  ;;  %v3621_v22 = vunpack.i.l.bf16 %v3620_v20 }
0x1533   : > { %v2323_v26 = vsel %vm1333_vm0, %v2307_v23, %v3621_v22  ;;  %v2324_v27 = vsel %vm1333_vm0, %v2305_v13, %v3622_v21  ;;  %v3688_v23 = vld [vmem:[%s4675_s15 + $0x20] sm:$0xff]  }
0x1534   : > { %v2325_v28 = vpack.c.bf16 %v2324_v27, %v2323_v26 }
0x1536   : > { %2443 = vmatmul.mubr.bf16.vlgmr.msra.gmra.mxu0 %v2325_v28 }
0x15f6   : > { %v2444_v31 = vpop.f32.mrf.mxu0 }
0x15f7   : > { %v2445_v50 = vadd.f32 %v3276_v29, %v2444_v31  ;;  %v3690_v31 = vld [vmem:[%s4675_s15 + $0x10] sm:$0xff]  }
0x15f8   : > { %v2446_v30 = vpop.f32.mrf.mxu0 }
0x15f9   : > { %v2451_v32 = vmul.f32 %v4000_v24, %v2445_v50  ;;  %v3691_v50 = vld [vmem:[%s4675_s15 + $0x8] sm:$0xff]   ;;  %v3692_v30 = vld [vmem:[%s4675_s15] sm:$0xff]  }
0x15fa   : > { %v2447_v55 = vpop.f32.mrf.mxu0 }
0x15fb   : > { %v2448_v33 = vadd.f32 %v3276_v29, %v2447_v55  ;;  %v2453_v34 = vadd.f32 %v2451_v32, %v4358_v11  ;;  %v3689_v29 = vld [vmem:[%s4675_s15 + $0x18] sm:$0xff]  }
0x15fc   : > { %v2449_v35 = vpop.f32.mrf.mxu0 }
0x15fd   : > { %v2452_v36 = vmul.f32 %v4005_v25, %v2448_v33  ;;  %v2459_v37 = vsel %vm828_vm7, %v2453_v34, 0.0 }
0x15fe   : > { %2460 = vadd.xlane.f32.xlu1 %v2459_v37 }
0x15ff   : > { %v2454_v38 = vadd.f32 %v2452_v36, %v4366_v15  ;;  %v3685_v15 = vld [vmem:[%s4673_s13 + $0x8] sm:$0xff]  }
0x1600   : > { %3528 = vmatpush3.bf16.msra.mxu1 %v3685_v15 }
0x1601   : > { %v2462_v40 = vsel %vm828_vm7, %v2454_v38, 0.0  ;;  %3529 = vmatprep.subr.bf16.mxu1 %v3794_v2 }
0x1602   : > { %2463 = vadd.xlane.f32.xlu0 %v2462_v40 }
0x1604   : > { %3530 = vmatpush3.bf16.msra.mxu1 %v3686_v53 }
0x1605   : > { %3535 = vmatprep.subr.bf16.mxu1 %v3794_v2 }
0x1687   : > { %v2461_v41 = vpop.xlane.xlu1 %2460 }
0x1688   : > { %v2465_v42 = vmul.f32 0.03125, %v2461_v41 }
0x168a   : > { %v2467_v43 = vsub.f32 %v2453_v34, %v2465_v42 }
0x168b   : > { %v2464_v39 = vpop.xlane.xlu0 %2463 }
0x168c   : > { %v2466_v44 = vmul.f32 0.03125, %v2464_v39  ;;  %v2469_v45 = vmul.f32 %v2467_v43, %v2467_v43 }
0x168e   : > { %v2468_v46 = vsub.f32 %v2454_v38, %v2466_v44  ;;  %v2471_v11 = vsel %vm828_vm7, %v2469_v45, 0.0 }
0x168f   : > { %2472 = vadd.xlane.f32.xlu1 %v2471_v11  ;;  %v3298_v11 = vld [vmem:[%s4676_s16] ss:$0 sm:$0xff] }
0x1690   : > { %v2470_v48 = vmul.f32 %v2468_v46, %v2468_v46 }
0x1692   : > { %v2474_v49 = vsel %vm828_vm7, %v2470_v48, 0.0 }
0x1693   : > { %2475 = vadd.xlane.f32.xlu1 %v2474_v49 }
0x1718   : > { %v2473_v51 = vpop.xlane.xlu1 %2472 }
0x1719   : > { %v2477_v54 = vmul.f32 0.03125, %v2473_v51 }
0x171b   : > { %v2479_v56 = vadd.f32 0.0001, %v2477_v54 }
0x171c   : > { %v2476_v58 = vpop.xlane.xlu1 %2475 }
0x171d   : > { %3753 = vrsqrt.f32 %v2479_v56  ;;  %v2478_v59 = vmul.f32 0.03125, %v2476_v58 }
0x171f   : > { %v2480_v60 = vadd.f32 0.0001, %v2478_v59 }
0x1721   : > { %3755 = vrsqrt.f32 %v2480_v60 }
0x172a   : > { %v3754_v61 = vpop.eup %3753 }
0x172b   : > { %v2483_v19 = vmul.f32 %v3754_v61, %v2467_v43 }
0x172d   : > { %v2491_v3 = vmul.f32 %v3292_v62, %v2483_v19 }
0x172e   : > { %v3756_v4 = vpop.eup %3755 }
0x172f   : > { %v2484_v47 = vmul.f32 %v3756_v4, %v2468_v46  ;;  %v2499_v5 = vadd.f32 %v3293_v63, %v2491_v3 }
0x1731   : > { %v2492_v6 = vmul.f32 %v3292_v62, %v2484_v47  ;;  %v2501_v8 = vmul.f32 %v4000_v24, %v2499_v5 }
0x1733   : > { %v2500_v52 = vadd.f32 %v3293_v63, %v2492_v6  ;;  %v2597_v10 = vrot.slane %v2501_v8, 1  ;;  %v2591_v13 = vrot.slane %v2501_v8, 7 }
0x1735   : > { %v2502_v9 = vmul.f32 %v4005_v25, %v2500_v52  ;;  %v3693_v52 = vld [vmem:[%s4677_s17 + $0x38] sm:$0xff]  }
0x1736   : > { %2887 = vmatpush1.bf16.msra.mxu0 %v3693_v52 }
0x1737   : > { %v3623_v14 = vpack.i.bf16 %v2502_v9, %v2501_v8  ;;  %v2503_v16 = vpack.c.bf16 %v2502_v9, %v2501_v8  ;;  %v2598_v0 = vrot.slane %v2502_v9, 1  ;;  %v2592_v17 = vrot.slane %v2502_v9, 7  ;;  %v3694_v9 = vld [vmem:[%s4677_s17 + $0x30] sm:$0xff]   ;;  %2888 = vmatprep.subr.bf16.mxu0 %v3793_v1 }
0x1739   : > { %3624 = vrot.lane.b32.xlu1 %v3623_v14, %s4708_s20  ;;  %3532 = vmatmul.mubr.msk.bf16.vlgmr.msra.gmra.mxu1 %vm828_vm7, %v2503_v16  ;;  %v2600_v20 = vsel %vm1310_vm14, %v2598_v0, %v2597_v10  ;;  %v2593_v21 = vsel %vm1303_vm13, %v2591_v13, %v2592_v17  ;;  %v2594_v26 = vsel %vm1303_vm13, %v2592_v17, %v2591_v13  ;;  %v3697_v13 = vld [vmem:[%s4677_s17 + $0x18] sm:$0xff]   ;;  %v3698_v14 = vld [vmem:[%s4677_s17 + $0x10] sm:$0xff]   ;;  %v3699_v16 = vld [vmem:[%s4677_s17 + $0x8] sm:$0xff]  }
0x173a   : > { %v2602_v22 = vmul.f32 %v4136_v57, %v2600_v20  ;;  %3536 = vmatpush3.bf16.msra.mxu1 %v3687_v12  ;;  %3547 = vmatprep.mubr.msk.bf16.mxu1 %vm3795_vm1, %v3794_v2  ;;  %v2599_v27 = vsel %vm1310_vm14, %v2597_v10, %v2598_v0  ;;  %v2595_v34 = vmul.f32 %v4151_v7, %v2594_v26  ;;  %v3695_v10 = vld [vmem:[%s4677_s17 + $0x28] sm:$0xff]   ;;  %v3696_v12 = vld [vmem:[%s4677_s17 + $0x20] sm:$0xff]   ;;  %v3701_v17 = vld [vmem:[%s4677_s17 + $0x58] sm:$0xff]  }
0x173b   : > { %3537 = vmatprep.subr.bf16.mxu1 %v3794_v2  ;;  %2889 = vmatpush1.bf16.msra.mxu0 %v3694_v9  ;;  %v3700_v0 = vld [vmem:[%s4677_s17] sm:$0xff]   ;;  %v3702_v20 = vld [vmem:[%s4677_s17 + $0x50] sm:$0xff]  }
0x173c   : > { %v3628_v28 = vpack.i.bf16 %v2602_v22, %v2599_v27  ;;  %2890 = vmatprep.subr.bf16.mxu0 %v3793_v1 }
0x173e   : > { %3629 = vrot.lane.b32.xlu0 %v3628_v28, %s3801_s5  ;;  %3538 = vmatpush3.bf16.msra.mxu1 %v3688_v23 }
0x173f   : > { %3539 = vmatprep.subr.bf16.mxu1 %v3794_v2  ;;  %2891 = vmatpush1.bf16.msra.mxu0 %v3695_v10 }
0x1740   : > { %2892 = vmatprep.subr.bf16.mxu0 %v3793_v1 }
0x1742   : > { %3540 = vmatpush3.bf16.msra.mxu1 %v3689_v29 }
0x1743   : > { %3541 = vmatprep.subr.bf16.mxu1 %v3794_v2  ;;  %2893 = vmatpush1.bf16.msra.mxu0 %v3696_v12 }
0x1744   : > { %2894 = vmatprep.subr.bf16.mxu0 %v3793_v1 }
0x1746   : > { %3542 = vmatpush3.bf16.msra.mxu1 %v3690_v31 }
0x1747   : > { %3543 = vmatprep.subr.bf16.mxu1 %v3794_v2  ;;  %2895 = vmatpush1.bf16.msra.mxu0 %v3697_v13 }
0x1748   : > { %2896 = vmatprep.subr.bf16.mxu0 %v3793_v1 }
0x174a   : > { %3544 = vmatpush3.bf16.msra.mxu1 %v3691_v50  ;;  %v3306_v50 = vld [vmem:[%s4676_s16 + $0x1] ss:$0 sm:$0xff] }
0x174b   : > { %3545 = vmatprep.subr.bf16.mxu1 %v3794_v2  ;;  %2897 = vmatpush1.bf16.msra.mxu0 %v3698_v14 }
0x174c   : > { %2898 = vmatprep.subr.bf16.mxu0 %v3793_v1 }
0x174e   : > { %3546 = vmatpush3.bf16.msra.mxu1 %v3692_v30 }
0x174f   : > { %3551 = vmatprep.subr.bf16.mxu1 %v3794_v2  ;;  %2899 = vmatpush1.bf16.msra.mxu0 %v3699_v16 }
0x1750   : > { %2900 = vmatprep.subr.bf16.mxu0 %v3793_v1 }
0x1753   : > { %2901 = vmatpush1.bf16.msra.mxu0 %v3700_v0 }
0x1754   : > { %2910 = vmatprep.subr.bf16.mxu0 %v3793_v1 }
0x1757   : > { %2911 = vmatpush2.bf16.msra.mxu0 %v3701_v17 }
0x1758   : > { %2912 = vmatprep.subr.bf16.mxu0 %v3793_v1 }
0x175b   : > { %2913 = vmatpush2.bf16.msra.mxu0 %v3702_v20 }
0x175c   : > { %2914 = vmatprep.subr.bf16.mxu0 %v3793_v1 }
0x17ab   : > { %v3625_v32 = vpop.permute.xlu1 %3624 }
0x17ac   : > { %v3627_v55 = vunpack.i.h.bf16 %v3625_v32  ;;  %v3626_v33 = vunpack.i.l.bf16 %v3625_v32  ;;  %v3307_v32 = vld [vmem:[%s4676_s16 + $0x2] ss:$0 sm:$0xff] }
0x17ae   : > { %v2619_v38 = vsel %vm828_vm7, %v2595_v34, %v3626_v33  ;;  %v2620_v40 = vsel %vm828_vm7, %v2593_v21, %v3627_v55  ;;  %v3703_v21 = vld [vmem:[%s4677_s17 + $0x48] sm:$0xff]  }
0x17af   : > { %2915 = vmatpush2.bf16.msra.mxu0 %v3703_v21  ;;  %v3705_v21 = vld [vmem:[%s4679_s19 + $0x18] sm:$0xff]  }
0x17b0   : > { %v3630_v35 = vpop.permute.xlu0 %3629  ;;  %2916 = vmatprep.subr.bf16.mxu0 %v3793_v1  ;;  %v3704_v1 = vld [vmem:[%s4677_s17 + $0x40] sm:$0xff]  }
0x17b1   : > { %v3632_v36 = vunpack.i.h.bf16 %v3630_v35  ;;  %v3631_v37 = vunpack.i.l.bf16 %v3630_v35 }
0x17b3   : > { %v2621_v41 = vsel %vm1333_vm0, %v2619_v38, %v3631_v37  ;;  %v2622_v42 = vsel %vm1333_vm0, %v2620_v40, %v3632_v36  ;;  %2917 = vmatpush2.bf16.msra.mxu0 %v3704_v1 }
0x17b4   : > { %v2623_v43 = vpack.c.bf16 %v2622_v42, %v2621_v41 }
0x17b6   : > { %3548 = vmatmul.mubr.msk.bf16.vlgmr.msra.gmra.mxu1 %vm1380_vm2, %v2623_v43 }
0x17b7   : > { %3559 = vmatprep.mubr.msk.bf16.mxu1 %vm3795_vm1, %v3794_v2  ;;  %3552 = vmatpush3.bf16.msra.mxu1 %v3705_v21  ;;  %vm3067_vm1 = vcmask 269312  }
0x17b8   : > { %3553 = vmatprep.subr.bf16.mxu1 %v3794_v2 }
0x17f9   : > { %v4530_v39 = vpop.f32.mrf.mxu1 }
0x17fb   : > { %v3533_v44 = vpop.f32.mrf.mxu1 }
0x17fd   : > { %v4532_v45 = vpop.f32.mrf.mxu1 }
0x17ff   : > { %v3534_v46 = vpop.f32.mrf.mxu1 }
0x1876   : > { %v2703_v48 = vpop.f32.mrf.mxu1 }
0x1877   : > { %v2704_v49 = vadd.f32 %v3298_v11, %v2703_v48 }
0x1878   : > { %v3549_v15 = vpop.f32.mrf.mxu1 }
0x1879   : > { %v2710_v53 = vmax.f32 %v2704_v49, 0.0 }
0x187a   : > { %v2706_v51 = vpop.f32.mrf.mxu1 }
0x187b   : > { %v2707_v54 = vadd.f32 %v3298_v11, %v2706_v51  ;;  %v2712_v56 = vsel %vm1333_vm0, %v2710_v53, 0.0 }
0x187c   : > { %2713 = vadd.xlane.f32.xlu1 %v2712_v56  ;;  %v3550_v58 = vpop.f32.mrf.mxu1 }
0x187d   : > { %v2711_v59 = vmax.f32 %v2707_v54, 0.0 }
0x187f   : > { %v2715_v60 = vsel %vm1333_vm0, %v2711_v59, 0.0 }
0x1880   : > { %2716 = vadd.xlane.f32.xlu0 %v2715_v60 }
0x1905   : > { %v2714_v61 = vpop.xlane.xlu1 %2713 }
0x1906   : > { %v2719_v62 = vmul.f32 0.015625, %v2714_v61 }
0x1908   : > { %v2721_v19 = vsub.f32 %v2710_v53, %v2719_v62 }
0x1909   : > { %v2717_v63 = vpop.xlane.xlu0 %2716 }
0x190a   : > { %v2720_v3 = vmul.f32 0.015625, %v2717_v63  ;;  %v2723_v4 = vmul.f32 %v2721_v19, %v2721_v19 }
0x190c   : > { %v2722_v47 = vsub.f32 %v2711_v59, %v2720_v3  ;;  %v2725_v5 = vsel %vm1333_vm0, %v2723_v4, 0.0 }
0x190d   : > { %2726 = vadd.xlane.f32.xlu1 %v2725_v5 }
0x190e   : > { %v2724_v6 = vmul.f32 %v2722_v47, %v2722_v47 }
0x1910   : > { %v2728_v8 = vsel %vm1333_vm0, %v2724_v6, 0.0 }
0x1911   : > { %2729 = vadd.xlane.f32.xlu0 %v2728_v8 }
0x1996   : > { %v2727_v22 = vpop.xlane.xlu1 %2726 }
0x1997   : > { %v2731_v23 = vmul.f32 0.015625, %v2727_v22  ;;  %v3706_v22 = vld [vmem:[%s4679_s19 + $0x10] sm:$0xff]  }
0x1998   : > { %3554 = vmatpush3.bf16.msra.mxu1 %v3706_v22 }
0x1999   : > { %v2733_v26 = vadd.f32 0.0001, %v2731_v23  ;;  %3555 = vmatprep.subr.bf16.mxu1 %v3794_v2  ;;  %v3707_v23 = vld [vmem:[%s4679_s19 + $0x8] sm:$0xff]  }
0x199a   : > { %v2730_v27 = vpop.xlane.xlu0 %2729 }
0x199b   : > { %3757 = vrsqrt.f32 %v2733_v26  ;;  %v2732_v28 = vmul.f32 0.015625, %v2730_v27  ;;  %v3708_v26 = vld [vmem:[%s4679_s19] sm:$0xff]  }
0x199c   : > { %3556 = vmatpush3.bf16.msra.mxu1 %v3707_v23 }
0x199d   : > { %v2734_v29 = vadd.f32 0.0001, %v2732_v28  ;;  %3557 = vmatprep.subr.bf16.mxu1 %v3794_v2  ;;  %v3323_v2 = vld [vmem:[%s4678_s18 + $0x2] ss:$0 sm:$0xff] }
0x199f   : > { %3759 = vrsqrt.f32 %v2734_v29 }
0x19a0   : > { %3558 = vmatpush3.bf16.msra.mxu1 %v3708_v26 }
0x19a8   : > { %v3758_v31 = vpop.eup %3757 }
0x19a9   : > { %v2737_v30 = vmul.f32 %v3758_v31, %v2721_v19 }
0x19ab   : > { %v2745_v55 = vmul.f32 %v3306_v50, %v2737_v30 }
0x19ac   : > { %v3760_v33 = vpop.eup %3759 }
0x19ad   : > { %v2738_v34 = vmul.f32 %v3760_v33, %v2722_v47  ;;  %v2753_v35 = vadd.f32 %v3307_v32, %v2745_v55  ;;  %v3322_v55 = vld [vmem:[%s4678_s18 + $0x1] ss:$0 sm:$0xff] }
0x19af   : > { %v2746_v36 = vmul.f32 %v3306_v50, %v2738_v34  ;;  %v2755_v37 = vmul.f32 %v4000_v24, %v2753_v35 }
0x19b1   : > { %v2754_v38 = vadd.f32 %v3307_v32, %v2746_v36  ;;  %v2787_v41 = vrot.slane %v2755_v37, 1  ;;  %v2781_v44 = vrot.slane %v2755_v37, 7 }
0x19b3   : > { %v2756_v40 = vmul.f32 %v4005_v25, %v2754_v38 }
0x19b5   : > { %v3633_v42 = vpack.i.bf16 %v2756_v40, %v2755_v37  ;;  %v2788_v43 = vrot.slane %v2756_v40, 1  ;;  %v2782_v46 = vrot.slane %v2756_v40, 7 }
0x19b7   : > { %3634 = vrot.lane.b32.xlu1 %v3633_v42, %s3801_s5  ;;  %v2790_v11 = vsel %vm1310_vm14, %v2788_v43, %v2787_v41  ;;  %v2783_v48 = vsel %vm1303_vm13, %v2781_v44, %v2782_v46  ;;  %v2784_v49 = vsel %vm1303_vm13, %v2782_v46, %v2781_v44  ;;  %v2789_v53 = vsel %vm1310_vm14, %v2787_v41, %v2788_v43  ;;  %v3324_v43 = vld [vmem:[#allocation2] ss:$0 sm:$0xff] }
0x19b8   : > { %v2792_v15 = vmul.f32 %v4136_v57, %v2790_v11  ;;  %v2785_v59 = vmul.f32 %v4151_v7, %v2784_v49  ;;  %v3308_v57 = vld [vmem:[%s4678_s18] ss:$0 sm:$0xff] }
0x19ba   : > { %v2804_v51 = vpack.c.bf16 %v2792_v15, %v2789_v53  ;;  %v3294_v53 = vld [vmem:[%s4674_s14] ss:$0 sm:$0xff] }
0x19bc   : > { %3321 = vmatprep.mubr.msk.bf16.mxu0 %vm1333_vm0, %v2804_v51  ;;  %v2565_v51 = vadd.f32 %v3294_v53, %v4530_v39 }
0x1a29   : > { %v3635_v54 = vpop.permute.xlu1 %3634 }
0x1a2a   : > { %v3637_v56 = vunpack.i.h.bf16 %v3635_v54  ;;  %v3636_v58 = vunpack.i.l.bf16 %v3635_v54  ;;  %v2571_v54 = vmul.f32 %v4000_v24, %v2565_v51 }
0x1a2c   : > { %v2801_v60 = vsel %vm1333_vm0, %v2785_v59, %v3636_v58  ;;  %v2802_v61 = vsel %vm1333_vm0, %v2783_v48, %v3637_v56  ;;  %v2568_v56 = vadd.f32 %v3294_v53, %v4532_v45 }
0x1a2d   : > { %v2803_v62 = vpack.c.bf16 %v2802_v61, %v2801_v60 }
0x1a2e   : > { %v2572_v61 = vmul.f32 %v4005_v25, %v2568_v56 }
0x1a2f   : > { %2919 = vmatmul.mubr.bf16.vlgmr.msra.gmra.mxu0 %v2803_v62 }
0x1aef   : > { %v2920_v18 = vpop.f32.mrf.mxu0 }
0x1af0   : > { %v2921_v19 = vadd.f32 %v3308_v57, %v2920_v18 }
0x1af1   : > { %v2922_v63 = vpop.f32.mrf.mxu0 }
0x1af2   : > { %v2927_v3 = vmax.f32 %v2921_v19, 0.0 }
0x1af3   : > { %v2923_v4 = vpop.f32.mrf.mxu0 }
0x1af4   : > { %v2924_v47 = vadd.f32 %v3308_v57, %v2923_v4  ;;  %v2929_v5 = vsel %vm1333_vm0, %v2927_v3, 0.0 }
0x1af5   : > { %v2925_v6 = vpop.f32.mrf.mxu0  ;;  %2930 = vadd.xlane.f32.xlu0 %v2929_v5 }
0x1af6   : > { %v2928_v7 = vmax.f32 %v2924_v47, 0.0 }
0x1af8   : > { %v2932_v8 = vsel %vm1333_vm0, %v2928_v7, 0.0 }
0x1af9   : > { %2933 = vadd.xlane.f32.xlu0 %v2932_v8 }
0x1b7e   : > { %v2931_v52 = vpop.xlane.xlu0 %2930 }
0x1b7f   : > { %v2935_v9 = vmul.f32 0.015625, %v2931_v52 }
0x1b81   : > { %v2937_v10 = vsub.f32 %v2927_v3, %v2935_v9 }
0x1b82   : > { %v2934_v12 = vpop.xlane.xlu0 %2933 }
0x1b83   : > { %v2936_v13 = vmul.f32 0.015625, %v2934_v12  ;;  %v2939_v14 = vmul.f32 %v2937_v10, %v2937_v10 }
0x1b85   : > { %v2938_v16 = vsub.f32 %v2928_v7, %v2936_v13  ;;  %v2941_v0 = vsel %vm1333_vm0, %v2939_v14, 0.0 }
0x1b86   : > { %2942 = vadd.xlane.f32.xlu0 %v2941_v0 }
0x1b87   : > { %v2940_v17 = vmul.f32 %v2938_v16, %v2938_v16 }
0x1b89   : > { %v2944_v20 = vsel %vm1333_vm0, %v2940_v17, 0.0 }
0x1b8a   : > { %2945 = vadd.xlane.f32.xlu0 %v2944_v20 }
0x1c0f   : > { %v2943_v27 = vpop.xlane.xlu0 %2942 }
0x1c10   : > { %v2947_v28 = vmul.f32 0.015625, %v2943_v27 }
0x1c12   : > { %v2949_v29 = vadd.f32 0.0001, %v2947_v28 }
0x1c13   : > { %v2946_v31 = vpop.xlane.xlu0 %2945 }
0x1c14   : > { %3761 = vrsqrt.f32 %v2949_v29  ;;  %v2948_v50 = vmul.f32 0.015625, %v2946_v31 }
0x1c16   : > { %v2950_v30 = vadd.f32 0.0001, %v2948_v50 }
0x1c18   : > { %3763 = vrsqrt.f32 %v2950_v30 }
0x1c21   : > { %v3762_v32 = vpop.eup %3761 }
0x1c22   : > { %v2953_v1 = vmul.f32 %v3762_v32, %v2937_v10 }
0x1c24   : > { %v2961_v33 = vmul.f32 %v3322_v55, %v2953_v1 }
0x1c25   : > { %v3764_v34 = vpop.eup %3763 }
0x1c26   : > { %v2954_v35 = vmul.f32 %v3764_v34, %v2938_v16  ;;  %v2969_v37 = vadd.f32 %v3323_v2, %v2961_v33 }
0x1c28   : > { %v2962_v36 = vmul.f32 %v3322_v55, %v2954_v35  ;;  %v2971_v40 = vmul.f32 %v4000_v24, %v2969_v37 }
0x1c2a   : > { %v2970_v38 = vadd.f32 %v3323_v2, %v2962_v36 }
0x1c2c   : > { %v2972_v41 = vmul.f32 %v4005_v25, %v2970_v38 }
0x1c2e   : > { %v2973_v42 = vpack.c.bf16 %v2972_v41, %v2971_v40 }
0x1c30   : > { %3560 = vmatmul.mubr.msk.bf16.vlgmr.msra.gmra.mxu1 %vm1333_vm0, %v2973_v42 }
0x1cf0   : > { %v3050_v44 = vpop.f32.mrf.mxu1 }
0x1cf1   : > { %v3051_v46 = vadd.f32 %v3324_v43, %v3050_v44 }
0x1cf2   : > { %v3561_v11 = vpop.f32.mrf.mxu1 }
0x1cf3   : > { %3059 = vrot.lane.b32.xlu1 %v3051_v46, %s4708_s20 }
0x1cf4   : > { %v3053_v48 = vpop.f32.mrf.mxu1 }
0x1cf5   : > { %v3054_v49 = vadd.f32 %v3324_v43, %v3053_v48 }
0x1cf6   : > { %v3562_v15 = vpop.f32.mrf.mxu1 }
0x1cf7   : > { %3061 = vrot.lane.b32.xlu0 %v3054_v49, %s4708_s20 }
0x1d65   : > { %v3060_v58 = vpop.permute.xlu1 %3059 }
0x1d66   : > { %v3065_v59 = vsel %vm828_vm7, %v2571_v54, %v3060_v58 }
0x1d67   : > { %v3068_v60 = vsel %vm3067_vm1, %v3065_v59, 0.0 }
0x1d68   : > { %3070 = vst [vmem:[%s672_s4] sm:$0xff] %v3068_v60 }
0x1d69   : > { %v3062_v62 = vpop.permute.xlu0 %3061 }
0x1d6a   : > { %v3066_v39 = vsel %vm828_vm7, %v2572_v61, %v3062_v62 }
0x1d6b   : > { %v3069_v57 = vsel %vm3067_vm1, %v3066_v39, 0.0 }
0x1d6c   : > { %3071 = vst [vmem:[%s672_s4 + $0x8] sm:$0xff] %v3069_v57 }
0x1d6d PF: > { %s34_s26 = sadd.s32 1, %s3790_s26  }
0x1d6e   : > { %p31_p1 = scmp.ge.s32.totalorder %s34_s26, 4  }
0x1d70   :  { %33 = sbr.rel (!%p31_p1) target bundleno = 8 (0x8), region = 155 }
0x1d75   :  { %3093 = vsyncpa [#allocation4], 1 }
0x1d76   :  { %3095 = vsyncpa [#allocation4 + $0x1], 1 }

</bundles_post_ra>
